<compile_context>
chip_gen: v7x
topology: tpu7x:2x2x1
jax: 0.10.0
libtpu: 0.0.40
codegen_flags: <defaults>
</compile_context>

<pallas_src>
import functools

import jax
import jax.numpy as jnp
from jax.experimental import pallas as pl
from jax.experimental.pallas import tpu as pltpu


def _round_up(x, m):
    return ((x + m - 1) // m) * m


def _vmem_cap():
    """Generation-aware VMEM budget (0.8 * physical), safe fallback for v7x."""
    try:
        return int(0.8 * pltpu.get_tpu_info().vmem_capacity_bytes)
    except Exception:
        return 48 << 20  # conservative: fits v7x's 64 MiB physical VMEM


# ---------------------------------------------------------------------------
# Path 1: zero-FLOP lane gather
# ---------------------------------------------------------------------------

def _gather_kernel(map_ref, x_ref, o_ref):
    # map_ref: (1, Mp) int32   -- padded mapping_sequence (same block every step)
    # x_ref  : (TB, Cp) dtype  -- full class axis of this batch tile
    # o_ref  : (TB, Mp) dtype
    tb = x_ref.shape[0]
    mp = map_ref.shape[1]
    idx = jnp.broadcast_to(map_ref[...], (tb, mp))  # (TB, Mp) int32, in-bounds
    o_ref[...] = jnp.take_along_axis(x_ref[...], idx, axis=1,
                                     mode="promise_in_bounds")


def _gather_call(x, map2d, TB, Cp, Mp, vmem_limit):
    Bp = x.shape[0]
    return pl.pallas_call(
        _gather_kernel,
        out_shape=jax.ShapeDtypeStruct((Bp, Mp), x.dtype),
        grid_spec=pltpu.PrefetchScalarGridSpec(
            num_scalar_prefetch=0,
            grid=(Bp // TB,),
            in_specs=[
                pl.BlockSpec((1, Mp), lambda i: (0, 0)),   # mapping (resident)
                pl.BlockSpec((TB, Cp), lambda i: (i, 0)),  # logits batch tile
            ],
            out_specs=pl.BlockSpec((TB, Mp), lambda i: (i, 0)),
        ),
        compiler_params=pltpu.CompilerParams(
            dimension_semantics=("parallel",),
            vmem_limit_bytes=vmem_limit),
    )(map2d, x)


_LANE_GATHER_OK = None


def _lane_gather_supported():
    """One-time probe: does Mosaic lower a dynamic lane-axis gather here?"""
    global _LANE_GATHER_OK
    if _LANE_GATHER_OK is None:
        try:
            xs = jnp.arange(8 * 128, dtype=jnp.float32).reshape(8, 128)
            ms = jnp.arange(127, -1, -1, dtype=jnp.int32).reshape(1, 128)
            out = jax.block_until_ready(_gather_call(xs, ms, 8, 128, 128, 32 << 20))
            _LANE_GATHER_OK = bool(jnp.array_equal(out, xs[:, ::-1]))
        except Exception:
            _LANE_GATHER_OK = False
    return _LANE_GATHER_OK


def _gather_path(logits, mapping, tb):
    B, C = logits.shape
    M = mapping.shape[0]
    dtype = logits.dtype
    itemsize = jnp.dtype(dtype).itemsize

    Cp = _round_up(C, 128)
    Mp = _round_up(M, 128)          # lane-dense output stores
    cap = _vmem_cap()
    budget = int(0.6 * cap)

    TB = min(tb, _round_up(B, 8))
    while TB > 8 and 2 * TB * (Cp + Mp) * itemsize > budget:
        TB = max(8, _round_up(TB // 2, 8))
    if 2 * TB * (Cp + Mp) * itemsize > budget:
        return None                 # class axis too big for VMEM -> matmul path
    Bp = _round_up(B, TB)

    x = logits
    if (Bp, Cp) != (B, C):
        x = jnp.pad(logits, ((0, Bp - B), (0, Cp - C)))
    # Pad mapping with a valid in-range index (0); padded columns are sliced off.
    map2d = jnp.pad(mapping.astype(jnp.int32), (0, Mp - M)).reshape(1, Mp)

    est = 2 * TB * (Cp + Mp) * itemsize + 2 * 8 * Mp * 4
    vmem_limit = int(min(max(2 * est + (8 << 20), 32 << 20), cap))
    out = _gather_call(x, map2d, TB, Cp, Mp, vmem_limit)
    return out[:B, :M]


# ---------------------------------------------------------------------------
# Path 2: one-hot matmul on the MXU (fallback / huge C)
# ---------------------------------------------------------------------------

def _onehot_matmul_kernel_acc(map_ref, x_ref, o_ref, acc_ref, *, precision):
    # map_ref: (1, TN) int32; x_ref: (TB, TK); o_ref: (TB, TN); acc_ref f32.
    k = pl.program_id(2)

    @pl.when(k == 0)
    def _():
        acc_ref[...] = jnp.zeros_like(acc_ref)

    tk, tn = x_ref.shape[1], map_ref.shape[1]
    # Shift the (1, TN) mapping row instead of the (TK, TN) iota (cheaper VALU).
    local_map = map_ref[...] - k * tk
    row_ids = jax.lax.broadcasted_iota(jnp.int32, (tk, tn), 0)
    onehot = (row_ids == local_map).astype(x_ref.dtype)            # (TK, TN)
    acc_ref[...] += jnp.dot(x_ref[...], onehot,
                            preferred_element_type=jnp.float32,
                            precision=precision)

    @pl.when(k == pl.num_programs(2) - 1)
    def _():
        o_ref[...] = acc_ref[...].astype(o_ref.dtype)


def _onehot_matmul_kernel_noacc(map_ref, x_ref, o_ref, *, precision):
    # f32 output: accumulate directly into the resident output block
    # (saves TB*TN*4 bytes of VMEM and the epilogue copy/cast).
    k = pl.program_id(2)

    @pl.when(k == 0)
    def _():
        o_ref[...] = jnp.zeros_like(o_ref)

    tk, tn = x_ref.shape[1], map_ref.shape[1]
    local_map = map_ref[...] - k * tk
    row_ids = jax.lax.broadcasted_iota(jnp.int32, (tk, tn), 0)
    onehot = (row_ids == local_map).astype(x_ref.dtype)
    o_ref[...] += jnp.dot(x_ref[...], onehot,
                          preferred_element_type=jnp.float32,
                          precision=precision)


def _matmul_path(logits, mapping, tb, tn, tk):
    B, C = logits.shape
    M = mapping.shape[0]
    dtype = logits.dtype

    # 256-aligned N/K tiles fill the 2x256x256 MXU on v6e/v7x (fine on v5e too).
    TN = min(tn, _round_up(M, 256))
    TK = min(tk, _round_up(C, 256))
    TB = min(tb, _round_up(B, 8))
    Mp = _round_up(M, TN)
    Cp = _round_up(C, TK)
    Bp = _round_up(B, TB)

    x = logits
    if (Bp, Cp) != (B, C):
        x = jnp.pad(logits, ((0, Bp - B), (0, Cp - C)))
    map2d = jnp.pad(mapping.astype(jnp.int32), (0, Mp - M)).reshape(1, Mp)

    use_acc = dtype != jnp.float32
    # f32 needs HIGHEST to keep the result bit-exact vs. the PyTorch gather;
    # bf16 x exact {0,1} one-hot is exact on the native bf16 MXU path.
    precision = (jax.lax.Precision.HIGHEST if dtype == jnp.float32
                 else jax.lax.Precision.DEFAULT)
    if use_acc:
        kernel = functools.partial(_onehot_matmul_kernel_acc, precision=precision)
        scratch = [pltpu.VMEM((TB, TN), jnp.float32)]
    else:
        kernel = functools.partial(_onehot_matmul_kernel_noacc, precision=precision)
        scratch = []

    itemsize = jnp.dtype(dtype).itemsize
    est = (2 * TB * TK * itemsize        # logits tile, double-buffered
           + 2 * TB * TN * itemsize      # output tile, double-buffered
           + 2 * 8 * TN * 4              # mapping block (sublane-padded)
           + (TB * TN * 4 if use_acc else 0))
    vmem_limit = int(min(max(2 * est + (8 << 20), 32 << 20), _vmem_cap()))

    # Note: the mapping block is a few KiB; custom pipeline_mode buffering on it
    # is noise, so we keep the default double-buffering.
    out = pl.pallas_call(
        kernel,
        out_shape=jax.ShapeDtypeStruct((Bp, Mp), dtype),
        grid_spec=pltpu.PrefetchScalarGridSpec(
            num_scalar_prefetch=0,
            grid=(Bp // TB, Mp // TN, Cp // TK),
            in_specs=[
                pl.BlockSpec((1, TN), lambda i, j, k: (0, j)),    # mapping tile
                pl.BlockSpec((TB, TK), lambda i, j, k: (i, k)),   # logits tile
            ],
            out_specs=pl.BlockSpec((TB, TN), lambda i, j, k: (i, j)),
            scratch_shapes=scratch,
        ),
        compiler_params=pltpu.CompilerParams(
            dimension_semantics=("parallel", "parallel", "arbitrary"),
            vmem_limit_bytes=vmem_limit),
    )(map2d, x)
    return out[:B, :M]


# ---------------------------------------------------------------------------
# Public forward
# ---------------------------------------------------------------------------

def label_mapping_forward(logits, mapping_sequence, *, tb=256, tn=512, tk=512,
                          path=None):
    """JAX/Pallas equivalent of LabelMappingBase.forward: logits[:, mapping_sequence]."""
    B, C = logits.shape
    M = int(mapping_sequence.shape[0])
    dtype = logits.dtype

    want_gather = (path == "gather") or (
        path is None and (dtype == jnp.float32 or B <= 64 or M >= 512))
    if path != "matmul" and want_gather and _lane_gather_supported():
        out = _gather_path(logits, mapping_sequence, tb)
        if out is not None:
            return out
    return _matmul_path(logits, mapping_sequence, tb, tn, tk)


if __name__ == "__main__":
    key = jax.random.PRNGKey(0)
    k1, k2 = jax.random.split(key)

    B, C, M = 8, 32, 16  # batch, num source classes, num mapped classes

    logits = jax.random.normal(k1, (B, C), dtype=jnp.float32)
    mapping_sequence = jax.random.randint(k2, (M,), minval=0, maxval=C,
                                          dtype=jnp.int32)

    # reference: the PyTorch semantics logits[:, mapping_sequence]
    ref = logits[:, mapping_sequence]

    # Default dispatch (gather path when supported, matmul fallback otherwise).
    out = jax.block_until_ready(label_mapping_forward(logits, mapping_sequence))
    assert out.shape == (B, M), out.shape
    assert jnp.array_equal(out, ref), "mismatch vs reference gather (default path)"

    # Also exercise the one-hot matmul path explicitly.
    out_mm = jax.block_until_ready(
        label_mapping_forward(logits, mapping_sequence, path="matmul"))
    assert jnp.array_equal(out_mm, ref), "mismatch vs reference gather (matmul path)"

    print("KERNEL_OK")
</pallas_src>

<mosaic_0001>
module attributes {stable_mosaic.version = 11 : i64} {
  func.func @_gather_kernel(%arg0: i32, %arg1: memref<1x128xi32, #tpu.memory_space<vmem>>, %arg2: memref<8x128xf32, #tpu.memory_space<vmem>>, %arg3: memref<8x128xf32, #tpu.memory_space<vmem>>) attributes {dimension_semantics = [#tpu.dimension_semantics<parallel>], iteration_bounds = array<i64: 1>, scalar_prefetch = 0 : i64, scratch_operands = 0 : i64, tpu.core_type = #tpu.core_type<tc>, window_params = [{pipeline_mode = #tpu.pipeline_mode<synchronous>, transform_indices = @transform_0, window_bounds = array<i64: 1, 128>}, {transform_indices = @transform_1, window_bounds = array<i64: 8, 128>}, {transform_indices = @transform_2, window_bounds = array<i64: 8, 128>}]} {
    %c0 = arith.constant 0 : index
    %c0_0 = arith.constant 0 : index
    %0 = vector.load %arg1[%c0, %c0_0] : memref<1x128xi32, #tpu.memory_space<vmem>>, vector<1x128xi32>
    %1 = vector.shape_cast %0 : vector<1x128xi32> to vector<1x128xi32>
    %2 = vector.broadcast %1 : vector<1x128xi32> to vector<8x128xi32>
    %c0_1 = arith.constant 0 : index
    %c0_2 = arith.constant 0 : index
    %3 = vector.load %arg2[%c0_1, %c0_2] : memref<8x128xf32, #tpu.memory_space<vmem>>, vector<8x128xf32>
    %4 = vector.shape_cast %2 : vector<8x128xi32> to vector<8x128x1xi32>
    %5 = vector.shape_cast %4 : vector<8x128x1xi32> to vector<8x128xi32>
    %6 = tpu.dynamic_gather %3[%5] in [1] : vector<8x128xf32>, vector<8x128xi32> -> vector<8x128xf32>
    %c0_3 = arith.constant 0 : index
    %c0_4 = arith.constant 0 : index
    %7 = vector.load %arg3[%c0_3, %c0_4] : memref<8x128xf32, #tpu.memory_space<vmem>>, vector<8x128xf32>
    tpu.vector_store %arg3[%c0_3, %c0_4], %6 {strides = array<i32>} : memref<8x128xf32, #tpu.memory_space<vmem>>, vector<8x128xf32>,
    return
  }
  func.func @transform_0(%arg0: i32) -> (i32, i32) {
    %c0_i32 = arith.constant 0 : i32
    %c0_i32_0 = arith.constant 0 : i32
    %c0_i32_1 = arith.constant 0 : i32
    return %c0_i32, %c0_i32_0 : i32, i32
  }
  func.func @transform_1(%arg0: i32) -> (i32, i32) {
    %c0_i32 = arith.constant 0 : i32
    %c0_i32_0 = arith.constant 0 : i32
    return %arg0, %c0_i32 : i32, i32
  }
  func.func @transform_2(%arg0: i32) -> (i32, i32) {
    %c0_i32 = arith.constant 0 : i32
    %c0_i32_0 = arith.constant 0 : i32
    return %arg0, %c0_i32 : i32, i32
  }
}

module attributes {stable_mosaic.version = 11 : i64} {
  func.func @_onehot_matmul_kernel_noacc(%arg0: i32, %arg1: i32, %arg2: i32, %arg3: memref<1x256xi32, #tpu.memory_space<vmem>>, %arg4: memref<8x256xf32, #tpu.memory_space<vmem>>, %arg5: memref<8x256xf32, #tpu.memory_space<vmem>>) attributes {dimension_semantics = [#tpu.dimension_semantics<parallel>, #tpu.dimension_semantics<parallel>, #tpu.dimension_semantics<arbitrary>], iteration_bounds = array<i64: 1, 1, 1>, scalar_prefetch = 0 : i64, scratch_operands = 0 : i64, tpu.core_type = #tpu.core_type<tc>, window_params = [{transform_indices = @transform_0, window_bounds = array<i64: 1, 256>}, {transform_indices = @transform_1, window_bounds = array<i64: 8, 256>}, {transform_indices = @transform_2, window_bounds = array<i64: 8, 256>}]} {
    %c0_i32 = arith.constant 0 : i32
    %0 = arith.cmpi eq, %arg2, %c0_i32 : i32
    %1 = arith.extui %0 : i1 to i32
    %c0_i32_0 = arith.constant 0 : i32
    %2 = arith.cmpi ne, %1, %c0_i32_0 : i32
    scf.if %2 {
      %cst_8 = arith.constant 0.000000e+00 : f32
      %17 = vector.broadcast %cst_8 : f32 to vector<8x256xf32>
      %c0_9 = arith.constant 0 : index
      %c0_10 = arith.constant 0 : index
      %18 = vector.load %arg5[%c0_9, %c0_10] : memref<8x256xf32, #tpu.memory_space<vmem>>, vector<8x256xf32>
      tpu.vector_store %arg5[%c0_9, %c0_10], %17 {strides = array<i32>} : memref<8x256xf32, #tpu.memory_space<vmem>>, vector<8x256xf32>,
    } else {
    }
    %c0 = arith.constant 0 : index
    %c0_1 = arith.constant 0 : index
    %3 = vector.load %arg3[%c0, %c0_1] : memref<1x256xi32, #tpu.memory_space<vmem>>, vector<1x256xi32>
    %c256_i32 = arith.constant 256 : i32
    %4 = arith.muli %arg2, %c256_i32 : i32
    %5 = vector.broadcast %4 : i32 to vector<1x256xi32>
    %6 = arith.subi %3, %5 : vector<1x256xi32>
    %7 = tpu.iota {dimensions = array<i32: 0>} : vector<256x256xi32>
    %8 = vector.broadcast %6 : vector<1x256xi32> to vector<256x256xi32>
    %9 = arith.cmpi eq, %7, %8 : vector<256x256xi32>
    %10 = arith.extui %9 : vector<256x256xi1> to vector<256x256xi32>
    %11 = arith.sitofp %10 : vector<256x256xi32> to vector<256x256xf32>
    %c0_2 = arith.constant 0 : index
    %c0_3 = arith.constant 0 : index
    %12 = vector.load %arg5[%c0_2, %c0_3] : memref<8x256xf32, #tpu.memory_space<vmem>>, vector<8x256xf32>
    %c0_4 = arith.constant 0 : index
    %c0_5 = arith.constant 0 : index
    %13 = vector.load %arg4[%c0_4, %c0_5] : memref<8x256xf32, #tpu.memory_space<vmem>>, vector<8x256xf32>
    %cst = arith.constant dense<0.000000e+00> : vector<8x256xf32>
    %14 = tpu.matmul %13, %11, %cst {dimension_numbers = #tpu.dot_dimension_numbers<[1], [0], [0], [1], [0, 0, 1, 1], [], []>, precision = #tpu.contract_precision<fp32>} : vector<8x256xf32>, vector<256x256xf32>, vector<8x256xf32> -> vector<8x256xf32>
    %15 = arith.addf %12, %14 : vector<8x256xf32>
    %c0_6 = arith.constant 0 : index
    %c0_7 = arith.constant 0 : index
    %16 = vector.load %arg5[%c0_6, %c0_7] : memref<8x256xf32, #tpu.memory_space<vmem>>, vector<8x256xf32>
    tpu.vector_store %arg5[%c0_6, %c0_7], %15 {strides = array<i32>} : memref<8x256xf32, #tpu.memory_space<vmem>>, vector<8x256xf32>,
    return
  }
  func.func @transform_0(%arg0: i32, %arg1: i32, %arg2: i32) -> (i32, i32) {
    %c0_i32 = arith.constant 0 : i32
    %c0_i32_0 = arith.constant 0 : i32
    return %c0_i32, %arg1 : i32, i32
  }
  func.func @transform_1(%arg0: i32, %arg1: i32, %arg2: i32) -> (i32, i32) {
    %c0_i32 = arith.constant 0 : i32
    return %arg0, %arg2 : i32, i32
  }
  func.func @transform_2(%arg0: i32, %arg1: i32, %arg2: i32) -> (i32, i32) {
    %c0_i32 = arith.constant 0 : i32
    return %arg0, %arg1 : i32, i32
  }
}

</mosaic_0001>

<bundles_post_ra>
// kernel: tpu_custom_call.1
= control target key start
LH: loop header
LB: loop body
LE: loop exit
PB: predicated region body
PF: predicated region fallthrough
CT: control target
= control target key end

     0   :  { %7 = vsyncpa [#allocation3], 0  ;;  %s193_s0 = inlined_call_operand.hbm [shape: s32[1,128], index: 0, kind: input, shape index: {}]   ;;  %s194_s1 = inlined_call_operand.hbm [shape: f32[8,128], index: 1, kind: input, shape index: {}]   ;;  %s195_s2 = inlined_call_operand.hbm [shape: f32[8,128], index: 2, kind: output, shape index: {}]  }
   0x1   :  { %8 = vsyncpa [#allocation6], 0 }
   0x2   :  { %9 = vsyncpa [#allocation4], 0  ;;  %s139_s9 = smov [#allocation2]   ;;  %s140_s11 = smov [#allocation5]  }
   0x3   :  { %s16_s10 = sshll.u32 %s139_s9, 4  ;;  %s26_s12 = sshll.u32 %s140_s11, 4  ;;  %s17_s10 = int_to_ptr.vmem [resolvable:$true] %s16_s10  ;;  %s27_s12 = int_to_ptr.vmem [resolvable:$true] %s26_s12 }
   0x4   :  { %s67_s15 = scalar_lea.hbm %s193_s0, 16 }
   0x5   :  { %p68_p0 = scmp.ne.s32.totalorder %s193_s0, %s67_s15  ;;  %p71_p1 = scmp.lt.u32.totalorder %s67_s15, %s193_s0 }
   0x7   :  { %p73_p2 = pnand %p71_p1, %p68_p0 }
   0x9   :  { %76 = shalt.err (!%p73_p2)
}
   0xa   :  { %s77_s20 = scalar_lea.vmem %s17_s10, 16  ;;  %s81_s21 = scalar_lea.vmem %s17_s10, 32 }
   0xb   :  { %p78_p3 = scmp.ne.s32.totalorder %s17_s10, %s77_s20  ;;  %p82_p4 = scmp.lt.s32.totalorder %s17_s10, %s17_s10 }
   0xc   :  { %p83_p5 = scmp.lt.s32.totalorder %s81_s21, %s77_s20 }
   0xe   :  { %p84_p6 = por %p83_p5, %p82_p4 }
  0x10   :  { %p85_p7 = pnand %p84_p6, %p78_p3 }
  0x12   :  { %88 = shalt.err (!%p85_p7)
}
  0x13   :  { %19 = dma.hbm_to_vmem [thread:$0]  %s193_s0, 16, %s17_s10, [#allocation3]  }
  0x14   :  { %s89_s26 = scalar_lea.hbm %s194_s1, 128 }
  0x15   :  { %p90_p8 = scmp.ne.s32.totalorder %s194_s1, %s89_s26  ;;  %p93_p9 = scmp.lt.u32.totalorder %s89_s26, %s194_s1 }
  0x17   :  { %p95_p10 = pnand %p93_p9, %p90_p8 }
  0x19   :  { %98 = shalt.err (!%p95_p10)
}
  0x1a   :  { %s99_s3 = scalar_lea.vmem %s27_s12, 128  ;;  %p104_p12 = scmp.lt.s32.totalorder %s27_s12, %s27_s12 }
  0x1b   :  { %p100_p11 = scmp.ne.s32.totalorder %s27_s12, %s99_s3  ;;  %p105_p13 = scmp.lt.s32.totalorder %s99_s3, %s99_s3 }
  0x1d   :  { %p106_p0 = por %p105_p13, %p104_p12 }
  0x1f   :  { %p107_p1 = pnand %p106_p0, %p100_p11 }
  0x21   :  { %110 = shalt.err (!%p107_p1)
}
  0x22   :  { %29 = dma.hbm_to_vmem [thread:$0]  %s194_s1, 128, %s27_s12, [#allocation6]  }
  0x23   :  { %133 = dma.done.wait [#allocation3], 16  }
  0x24   :  { %134 = vsyncadd [#allocation3], 4294967280 }
  0x25   :  { %135 = dma.done.wait [#allocation6], 128  }
  0x26   :  { %136 = vsyncadd [#allocation6], 4294967168  ;;  %v62_v0 = vld [vmem:[#allocation2] ss:$0 sm:$0xff]  ;;  %v41_v1 = vld [vmem:[#allocation5] sm:$0xff]  ;;  %s141_s5 = smov [#allocation7]  }
  0x27   :  { %66 = vset.pattern.permute.xlu0 %v62_v0  ;;  %s52_s6 = sshll.u32 %s141_s5, 4  ;;  %s53_s6 = int_to_ptr.vmem [resolvable:$true] %s52_s6 }
  0x28   :  { %s111_s7 = scalar_lea.vmem %s53_s6, 128  ;;  %p116_p3 = scmp.lt.s32.totalorder %s53_s6, %s53_s6 }
  0x29   :  { %p112_p2 = scmp.ne.s32.totalorder %s53_s6, %s111_s7  ;;  %p117_p4 = scmp.lt.s32.totalorder %s111_s7, %s111_s7 }
  0x2b   :  { %43 = vperm.xlu0 %66, %v41_v1   ;;  %p118_p5 = por %p117_p4, %p116_p3 }
  0x2d   :  { %p119_p6 = pnand %p118_p5, %p112_p2 }
  0xaa   :  { %v44_v2 = vpop.permute.xlu0 %43 }
  0xab   :  { %45 = vst [vmem:[#allocation7] sm:$0xff] %v44_v2 }
  0xac   :  { %122 = shalt.err (!%p119_p6)
}
  0xad   :  { %s123_s9 = scalar_lea.hbm %s195_s2, 128 }
  0xae   :  { %p124_p7 = scmp.ne.s32.totalorder %s195_s2, %s123_s9  ;;  %p127_p8 = scmp.lt.u32.totalorder %s123_s9, %s195_s2 }
  0xb0   :  { %p129_p9 = pnand %p127_p8, %p124_p7 }
  0xb2   :  { %132 = shalt.err (!%p129_p9)
}
  0xb3   :  { %55 = dma.vmem_to_hbm [thread:$0]  %s53_s6, 128, %s195_s2, [#allocation4]  }
  0xb4   :  { %137 = dma.done.wait [#allocation4], 128  }
  0xb5   :  { %138 = vsyncadd [#allocation4], 4294967168 }
  0xb6   :  { %59 = vsyncpa [#allocation3], 1 }
  0xb7   :  { %60 = vsyncpa [#allocation6], 1 }
  0xb8   :  { %61 = vsyncpa [#allocation4], 1 }

// kernel: tpu_custom_call.1
= control target key start
LH: loop header
LB: loop body
LE: loop exit
PB: predicated region body
PF: predicated region fallthrough
CT: control target
= control target key end

     0   :  { %7 = vsyncpa [#allocation3], 0  ;;  %s3887_s0 = inlined_call_operand.hbm [shape: s32[1,256], index: 0, kind: input, shape index: {}]   ;;  %s3888_s1 = inlined_call_operand.hbm [shape: f32[8,256], index: 1, kind: input, shape index: {}]   ;;  %s3889_s2 = inlined_call_operand.hbm [shape: f32[8,256], index: 2, kind: output, shape index: {}]  }
   0x1   :  { %8 = vsyncpa [#allocation6], 0 }
   0x2   :  { %9 = vsyncpa [#allocation4], 0  ;;  %s2314_s9 = smov [#allocation2]   ;;  %s2315_s11 = smov [#allocation5]  }
   0x3   :  { %s16_s10 = sshll.u32 %s2314_s9, 4  ;;  %s26_s12 = sshll.u32 %s2315_s11, 4  ;;  %s17_s10 = int_to_ptr.vmem [resolvable:$true] %s16_s10  ;;  %s27_s12 = int_to_ptr.vmem [resolvable:$true] %s26_s12 }
   0x4   :  { %s2242_s15 = scalar_lea.hbm %s3887_s0, 32 }
   0x5   :  { %p2243_p0 = scmp.ne.s32.totalorder %s3887_s0, %s2242_s15  ;;  %p2246_p1 = scmp.lt.u32.totalorder %s2242_s15, %s3887_s0 }
   0x7   :  { %p2248_p2 = pnand %p2246_p1, %p2243_p0 }
   0x9   :  { %2251 = shalt.err (!%p2248_p2)
}
   0xa   :  { %s2252_s20 = scalar_lea.vmem %s17_s10, 32  ;;  %p2257_p4 = scmp.lt.s32.totalorder %s17_s10, %s17_s10 }
   0xb   :  { %p2253_p3 = scmp.ne.s32.totalorder %s17_s10, %s2252_s20  ;;  %p2258_p5 = scmp.lt.s32.totalorder %s2252_s20, %s2252_s20 }
   0xd   :  { %p2259_p6 = por %p2258_p5, %p2257_p4 }
   0xf   :  { %p2260_p7 = pnand %p2259_p6, %p2253_p3 }
  0x11   :  { %2263 = shalt.err (!%p2260_p7)
}
  0x12   :  { %19 = dma.hbm_to_vmem [thread:$0]  %s3887_s0, 32, %s17_s10, [#allocation3]  }
  0x13   :  { %s2264_s25 = scalar_lea.hbm %s3888_s1, 256 }
  0x14   :  { %p2265_p8 = scmp.ne.s32.totalorder %s3888_s1, %s2264_s25  ;;  %p2268_p9 = scmp.lt.u32.totalorder %s2264_s25, %s3888_s1 }
  0x16   :  { %p2270_p10 = pnand %p2268_p9, %p2265_p8 }
  0x18   :  { %2273 = shalt.err (!%p2270_p10)
}
  0x19   :  { %s2274_s30 = scalar_lea.vmem %s27_s12, 256  ;;  %p2279_p12 = scmp.lt.s32.totalorder %s27_s12, %s27_s12 }
  0x1a   :  { %p2275_p11 = scmp.ne.s32.totalorder %s27_s12, %s2274_s30  ;;  %p2280_p13 = scmp.lt.s32.totalorder %s2274_s30, %s2274_s30 }
  0x1c   :  { %p2281_p0 = por %p2280_p13, %p2279_p12 }
  0x1e   :  { %p2282_p1 = pnand %p2281_p0, %p2275_p11 }
  0x20   :  { %2285 = shalt.err (!%p2282_p1)
}
  0x21   :  { %29 = dma.hbm_to_vmem [thread:$0]  %s3888_s1, 256, %s27_s12, [#allocation6]  }
  0x22   :  { %2308 = dma.done.wait [#allocation3], 32  }
  0x23   :  { %2309 = vsyncadd [#allocation3], 4294967264 }
  0x24   :  { %2310 = dma.done.wait [#allocation6], 256  }
  0x25   :  { %2311 = vsyncadd [#allocation6], 4294967040  ;;  %v46_v0 = vlaneseq  ;;  %v42_v5 = vld [vmem:[#allocation2] sm:$0x3]  ;;  %v4044_v12 = vmov 0  ;;  %v3923_v13 = vmov 0.0  }
  0x26   :  { %v3911_v18 = vmov 1.0|1.0   ;;  %v4047_v19 = vmov 0  ;;  %v4052_v26 = vmov 0  ;;  %v4055_v35 = vmov 0  ;;  %s2318_s1 = smov [#allocation7]  }
  0x27   :  { %v2358_v1 = vshrl.u32 %v46_v0, 7  ;;  %v4060_v47 = vmov 0  ;;  %v4064_v52 = vmov 0  ;;  %v4068_v56 = vmov 0  ;;  %s1577_s4 = sshll.u32 %s2318_s1, 4  ;;  %s1578_s4 = int_to_ptr.vmem [resolvable:$true] %s1577_s4 }
  0x28   :  { %v4072_v0 = vmov 0  ;;  %s2286_s5 = scalar_lea.vmem %s1578_s4, 256  ;;  %p2291_p3 = scmp.lt.s32.totalorder %s1578_s4, %s1578_s4 }
  0x29   :  { %v81_v2 = vsub.s32 0, %v2358_v1  ;;  %v85_v3 = vsub.s32 1, %v2358_v1  ;;  %v48_v4 = vadd.s32 8, %v2358_v1  ;;  %v49_v8 = vadd.s32 16, %v2358_v1  ;;  %p2287_p2 = scmp.ne.s32.totalorder %s1578_s4, %s2286_s5  ;;  %p2292_p4 = scmp.lt.s32.totalorder %s2286_s5, %s2286_s5 }
  0x2a   :  { %v50_v9 = vadd.s32 24, %v2358_v1  ;;  %v2370_v10 = vadd.s32 32, %v2358_v1  ;;  %v2373_v11 = vadd.s32 40, %v2358_v1  ;;  %v2393_v16 = vadd.s32 48, %v2358_v1 }
  0x2b   :  { %v2363_v6 = vrot.slane %v42_v5, %v81_v2  ;;  %v2365_v7 = vrot.slane %v42_v5, %v85_v3  ;;  %v2396_v17 = vadd.s32 56, %v2358_v1  ;;  %v2411_v21 = vadd.s32 64, %v2358_v1  ;;  %p2293_p5 = por %p2292_p4, %p2291_p3 }
  0x2c   :  { %v2414_v22 = vadd.s32 72, %v2358_v1  ;;  %v2417_v23 = vadd.s32 80, %v2358_v1  ;;  %v2430_v25 = vadd.s32 88, %v2358_v1  ;;  %v2442_v27 = vadd.s32 96, %v2358_v1 }
  0x2d   :  { %4043 = vst [vmem:[#allocation11_spill] sm:$0xff] %v2363_v6  ;;  %vm88_vm0 = vcmp.eq.s32.totalorder %v2358_v1, %v2365_v7  ;;  %vm90_vm1 = vcmp.eq.s32.totalorder %v48_v4, %v2365_v7  ;;  %vm87_vm2 = vcmp.eq.s32.totalorder %v2358_v1, %v2363_v6  ;;  %vm89_vm3 = vcmp.eq.s32.totalorder %v48_v4, %v2363_v6  ;;  %p2294_p6 = pnand %p2293_p5, %p2287_p2 }
  0x2e   :  { %vm2386_vm4 = vmpackc.low %vm90_vm1, %vm88_vm0  ;;  %v1587_v14 = vsel %vm87_vm2, 1.0, %v3923_v13  ;;  %v1589_v15 = vsel %vm89_vm3, 1.0, %v3923_v13  ;;  %vm92_vm6 = vcmp.eq.s32.totalorder %v49_v8, %v2365_v7  ;;  %vm94_vm7 = vcmp.eq.s32.totalorder %v50_v9, %v2365_v7 }
  0x2f   :  { %v4045_v12 = vsel %vm2386_vm4, 4294967295, %v4044_v12  ;;  %1844 = vmatprep.subr.msk.bf16.mxu1 %vm2386_vm4, %v3911_v18  ;;  %2036 = vmatprep.subr.msk.bf16.mxu0 %vm2386_vm4, %v3911_v18  ;;  %vm2404_vm5 = vmpackc.low %vm89_vm3, %vm87_vm2  ;;  %v2408_v20 = vsub.f32 %v1587_v14, %v1587_v14  ;;  %v2422_v24 = vsub.f32 %v1589_v15, %v1589_v15  ;;  %vm91_vm9 = vcmp.eq.s32.totalorder %v49_v8, %v2363_v6 }
  0x30   :  { %4046 = vst [vmem:[#allocation12_spill] sm:$0xff] %v4045_v12  ;;  %v4048_v19 = vsel %vm2404_vm5, 4294967295, %v4047_v19  ;;  %1846 = vmatpush1.bf16.msk.msra.mxu1 %vm2404_vm5, %v3911_v18  ;;  %2038 = vmatpush1.bf16.msk.msra.mxu0 %vm2404_vm5, %v3911_v18  ;;  %vm2436_vm8 = vmpackc.low %vm94_vm7, %vm92_vm6  ;;  %v2445_v28 = vadd.s32 104, %v2358_v1  ;;  %v2448_v29 = vadd.s32 112, %v2358_v1  ;;  %v1588_v30 = vsel %vm88_vm0, 1.0, %v3923_v13 }
  0x31   :  { %4049 = vst [vmem:[#allocation13_spill] sm:$0xff] %v4048_v19  ;;  %4050 = vst [vmem:[#allocation14_spill] sm:$0xff] %v2408_v20  ;;  %v4053_v26 = vsel %vm2436_vm8, 4294967295, %v4052_v26  ;;  %v3905_v31 = vand.u32 4294901760, %v2408_v20  ;;  %1848 = vmatprep.subr.msk.bf16.mxu1 %vm2436_vm8, %v3911_v18  ;;  %2040 = vmatprep.subr.msk.bf16.mxu0 %vm2436_vm8, %v3911_v18  ;;  %vm93_vm10 = vcmp.eq.s32.totalorder %v50_v9, %v2363_v6  ;;  %v2463_v32 = vadd.s32 120, %v2358_v1 }
  0x32   :  { %4051 = vst [vmem:[#allocation15_spill] sm:$0xff] %v2422_v24  ;;  %4054 = vst [vmem:[#allocation16_spill] sm:$0xff] %v4053_v26  ;;  %v1590_v33 = vsel %vm90_vm1, 1.0, %v3923_v13  ;;  %v3904_v34 = vand.u32 4294901760, %v2422_v24  ;;  %vm96_vm12 = vcmp.eq.s32.totalorder %v2370_v10, %v2365_v7  ;;  %v2480_v36 = vadd.s32 128, %v2358_v1 }
  0x33   :  { %vm2473_vm11 = vmpackc.low %vm93_vm10, %vm91_vm9  ;;  %v2489_v37 = vadd.s32 136, %v2358_v1  ;;  %v2492_v38 = vadd.s32 144, %v2358_v1  ;;  %v2495_v39 = vadd.s32 152, %v2358_v1  ;;  %v2498_v40 = vadd.s32 160, %v2358_v1 }
  0x34   :  { %v4056_v35 = vsel %vm2473_vm11, 4294967295, %v4055_v35  ;;  %1850 = vmatpush1.bf16.msk.msra.mxu1 %vm2473_vm11, %v3911_v18  ;;  %2042 = vmatpush1.bf16.msk.msra.mxu0 %vm2473_vm11, %v3911_v18  ;;  %v2500_v41 = vsub.f32 %v1588_v30, %v1588_v30  ;;  %v1592_v42 = vsel %vm92_vm6, 1.0, %v3923_v13  ;;  %vm98_vm13 = vcmp.eq.s32.totalorder %v2373_v11, %v2365_v7 }
  0x35   :  { %4057 = vst [vmem:[#allocation17_spill] sm:$0xff] %v4056_v35  ;;  %vm95_vm14 = vcmp.eq.s32.totalorder %v2370_v10, %v2363_v6  ;;  %v2509_v43 = vsub.f32 %v1590_v33, %v1590_v33  ;;  %v2514_v44 = vsub.f32 %v2408_v20, %v3905_v31  ;;  %v1594_v45 = vsel %vm94_vm7, 1.0, %v3923_v13  ;;  %vm2528_vm15 = vmpackc.low %vm98_vm13, %vm96_vm12 }
  0x36   :  { %4058 = vst [vmem:[#allocation18_spill] sm:$0xff] %v2500_v41  ;;  %v1591_v46 = vsel %vm91_vm9, 1.0, %v3923_v13  ;;  %v4061_v47 = vsel %vm2528_vm15, 4294967295, %v4060_v47  ;;  %v2535_v48 = vsub.f32 %v2422_v24, %v3904_v34  ;;  %v1593_v49 = vsel %vm93_vm10, 1.0, %v3923_v13  ;;  %1852 = vmatprep.subr.msk.bf16.mxu1 %vm2528_vm15, %v3911_v18  ;;  %2044 = vmatprep.subr.msk.bf16.mxu0 %vm2528_vm15, %v3911_v18 }
  0x37   :  { %4059 = vst [vmem:[#allocation19_spill] sm:$0xff] %v2509_v43  ;;  %4062 = vst [vmem:[#allocation20_spill] sm:$0xff] %v4061_v47  ;;  %vm97_vm0 = vcmp.eq.s32.totalorder %v2373_v11, %v2363_v6  ;;  %vm100_vm1 = vcmp.eq.s32.totalorder %v2393_v16, %v2365_v7  ;;  %v2550_v50 = vsub.f32 %v1592_v42, %v1592_v42  ;;  %v1596_v51 = vsel %vm96_vm12, 1.0, %v3923_v13 }
  0x38   :  { %vm2562_vm2 = vmpackc.low %vm97_vm0, %vm95_vm14  ;;  %vm3890_vm3 = vcmp.eq.s32.totalorder %v2396_v17, %v2365_v7  ;;  %v2569_v53 = vadd.s32 168, %v2358_v1  ;;  %v2571_v54 = vsub.f32 %v1594_v45, %v1594_v45  ;;  %v2573_v55 = vsub.f32 %v1591_v46, %v1591_v46 }
  0x39   :  { %4063 = vst [vmem:[#allocation21_spill] sm:$0xff] %v2550_v50  ;;  %v4065_v52 = vsel %vm2562_vm2, 4294967295, %v4064_v52  ;;  %1854 = vmatpush1.bf16.msk.msra.mxu1 %vm2562_vm2, %v3911_v18  ;;  %2046 = vmatpush1.bf16.msk.msra.mxu0 %vm2562_vm2, %v3911_v18  ;;  %vm2587_vm6 = vmpackc.low %vm3890_vm3, %vm100_vm1  ;;  %vm99_vm7 = vcmp.eq.s32.totalorder %v2393_v16, %v2363_v6  ;;  %v2594_v57 = vadd.s32 176, %v2358_v1  ;;  %v2597_v59 = vsub.f32 %v1593_v49, %v1593_v49 }
  0x3a   :  { %4066 = vst [vmem:[#allocation22_spill] sm:$0xff] %v4065_v52  ;;  %4067 = vst [vmem:[#allocation23_spill] sm:$0xff] %v2573_v55  ;;  %v4069_v56 = vsel %vm2587_vm6, 4294967295, %v4068_v56  ;;  %v1595_v60 = vsel %vm95_vm14, 1.0, %v3923_v13  ;;  %1856 = vmatprep.subr.msk.bf16.mxu1 %vm2587_vm6, %v3911_v18  ;;  %2048 = vmatprep.subr.msk.bf16.mxu0 %vm2587_vm6, %v3911_v18  ;;  %vm101_vm9 = vcmp.eq.s32.totalorder %v2396_v17, %v2363_v6  ;;  %v1597_v63 = vsel %vm97_vm0, 1.0, %v3923_v13 }
  0x3b   :  { %4070 = vst [vmem:[#allocation24_spill] sm:$0xff] %v4069_v56  ;;  %4071 = vst [vmem:[#allocation25_spill] sm:$0xff] %v2597_v59  ;;  %v2612_v62 = vsub.f32 %v1596_v51, %v1596_v51  ;;  %vm104_vm12 = vcmp.eq.s32.totalorder %v2411_v21, %v2365_v7  ;;  %v1599_v2 = vsel %vm99_vm7, 1.0, %v3923_v13  ;;  %v1601_v3 = vsel %vm101_vm9, 1.0, %v3923_v13 }
  0x3c   :  { %vm2618_vm10 = vmpackc.low %vm101_vm9, %vm99_vm7  ;;  %vm3893_vm14 = vcmp.eq.s32.totalorder %v2414_v22, %v2365_v7  ;;  %vm3892_vm3 = vcmp.eq.s32.totalorder %v2411_v21, %v2363_v6  ;;  %v1598_v5 = vsel %vm98_vm13, 1.0, %v3923_v13  ;;  %v2635_v8 = vsub.f32 %v1595_v60, %v1595_v60 }
  0x3d   :  { %v4073_v0 = vsel %vm2618_vm10, 4294967295, %v4072_v0  ;;  %1858 = vmatpush1.bf16.msk.msra.mxu1 %vm2618_vm10, %v3911_v18  ;;  %2050 = vmatpush1.bf16.msk.msra.mxu0 %vm2618_vm10, %v3911_v18  ;;  %vm2649_vm0 = vmpackc.low %vm3893_vm14, %vm104_vm12  ;;  %v4076_v9 = vmov 0  ;;  %vm3891_vm13 = vcmp.eq.s32.totalorder %v2414_v22, %v2363_v6  ;;  %v2656_v11 = vsub.f32 %v1597_v63, %v1597_v63 }
  0x3e   :  { %4074 = vst [vmem:[#allocation26_spill] sm:$0xff] %v4073_v0  ;;  %4075 = vst [vmem:[#allocation27_spill] sm:$0xff] %v2635_v8  ;;  %v4077_v9 = vsel %vm2649_vm0, 4294967295, %v4076_v9  ;;  %v1600_v14 = vsel %vm100_vm1, 1.0, %v3923_v13  ;;  %vm4080_vm7 = vcmp.eq.s32.totalorder %v2396_v17, %v2365_v7  ;;  %1860 = vmatprep.subr.msk.bf16.mxu1 %vm2649_vm0, %v3911_v18  ;;  %2052 = vmatprep.subr.msk.bf16.mxu0 %vm2649_vm0, %v3911_v18  ;;  %v4081_v16 = vmov 0 }
  0x3f   :  { %4078 = vst [vmem:[#allocation28_spill] sm:$0xff] %v4077_v9  ;;  %4079 = vst [vmem:[#allocation29_spill] sm:$0xff] %v2656_v11  ;;  %v1602_v15 = vsel %vm4080_vm7, 1.0, %v3923_v13  ;;  %v2682_v17 = vsub.f32 %v1599_v2, %v1599_v2  ;;  %v2684_v30 = vsub.f32 %v1601_v3, %v1601_v3  ;;  %vm3895_vm9 = vcmp.eq.s32.totalorder %v2417_v23, %v2365_v7 }
  0x40   :  { %vm2678_vm1 = vmpackc.low %vm3891_vm13, %vm3892_vm3  ;;  %vm3894_vm7 = vcmp.eq.s32.totalorder %v2430_v25, %v2365_v7  ;;  %v2690_v33 = vsub.f32 %v1598_v5, %v1598_v5  ;;  %v1604_v42 = vsel %vm104_vm12, 1.0, %v3923_v13  ;;  %v4086_v45 = vmov 0 }
  0x41   :  { %v4082_v16 = vsel %vm2678_vm1, 4294967295, %v4081_v16  ;;  %4084 = vst [vmem:[#allocation31_spill] sm:$0xff] %v2682_v17  ;;  %4085 = vst [vmem:[#allocation32_spill] sm:$0xff] %v2684_v30  ;;  %vm3897_vm3 = vcmp.eq.s32.totalorder %v2417_v23, %v2363_v6  ;;  %vm3896_vm14 = vcmp.eq.s32.totalorder %v2430_v25, %v2363_v6  ;;  %v2711_v49 = vsub.f32 %v1600_v14, %v1600_v14 }
  0x42   :  { %4083 = vst [vmem:[#allocation30_spill] sm:$0xff] %v4082_v16  ;;  %vm2702_vm13 = vmpackc.low %vm3894_vm7, %vm3895_vm9  ;;  %vm4089_vm12 = vcmp.eq.s32.totalorder %v2414_v22, %v2365_v7  ;;  %vm4090_vm7 = vcmp.eq.s32.totalorder %v2411_v21, %v2363_v6  ;;  %1862 = vmatpush1.bf16.msk.msra.mxu1 %vm2678_vm1, %v3911_v18  ;;  %2054 = vmatpush1.bf16.msk.msra.mxu0 %vm2678_vm1, %v3911_v18  ;;  %v4092_v21 = vmov 0  ;;  %v4111_v34 = vmov 0 }
  0x43   :  { %v4087_v45 = vsel %vm2702_vm13, 4294967295, %v4086_v45  ;;  %v1606_v51 = vsel %vm4089_vm12, 1.0, %v3923_v13  ;;  %v1603_v60 = vsel %vm4090_vm7, 1.0, %v3923_v13  ;;  %v2727_v63 = vsub.f32 %v1602_v15, %v1602_v15  ;;  %1864 = vmatprep.subr.msk.bf16.mxu1 %vm2702_vm13, %v3911_v18  ;;  %2056 = vmatprep.subr.msk.bf16.mxu0 %vm2702_vm13, %v3911_v18  ;;  %vm2745_vm7 = vmpackc.low %vm3896_vm14, %vm3897_vm3 }
  0x44   :  { %4088 = vst [vmem:[#allocation33_spill] sm:$0xff] %v4087_v45  ;;  %vm4091_vm9 = vcmp.eq.s32.totalorder %v2414_v22, %v2363_v6  ;;  %v4093_v21 = vsel %vm2745_vm7, 4294967295, %v4092_v21  ;;  %vm3900_vm12 = vcmp.eq.s32.totalorder %v2445_v28, %v2365_v7  ;;  %v2756_v14 = vsub.f32 %v1604_v42, %v1604_v42 }
  0x45   :  { %v1605_v2 = vsel %vm4091_vm9, 1.0, %v3923_v13  ;;  %4094 = vst [vmem:[#allocation34_spill] sm:$0xff] %v4093_v21  ;;  %vm3901_vm9 = vcmp.eq.s32.totalorder %v2442_v27, %v2365_v7  ;;  %v4095_v15 = vmov 0  ;;  %v2768_v46 = vsub.f32 %v1606_v51, %v1606_v51 }
  0x46   :  { %vm2764_vm14 = vmpackc.low %vm3900_vm12, %vm3901_vm9  ;;  %v2770_v61 = vsub.f32 %v1603_v60, %v1603_v60  ;;  %vm111_vm3 = vcmp.eq.s32.totalorder %v2442_v27, %v2363_v6  ;;  %vm113_vm13 = vcmp.eq.s32.totalorder %v2445_v28, %v2363_v6  ;;  %v2776_v42 = vsub.f32 %v1605_v2, %v1605_v2  ;;  %1866 = vmatpush1.bf16.msk.msra.mxu1 %vm2745_vm7, %v3911_v18 }
  0x47   :  { %v4096_v15 = vsel %vm2764_vm14, 4294967295, %v4095_v15  ;;  %vm4100_vm1 = vcmp.eq.s32.totalorder %v2417_v23, %v2365_v7  ;;  %vm4101_vm12 = vcmp.eq.s32.totalorder %v2417_v23, %v2363_v6  ;;  %vm4102_vm9 = vcmp.eq.s32.totalorder %v2430_v25, %v2363_v6  ;;  %2058 = vmatpush1.bf16.msk.msra.mxu0 %vm2745_vm7, %v3911_v18  ;;  %1868 = vmatprep.subr.msk.bf16.mxu1 %vm2764_vm14, %v3911_v18 }
  0x48   :  { %4097 = vst [vmem:[#allocation35_spill] sm:$0xff] %v4096_v15  ;;  %4098 = vst [vmem:[#allocation36_spill] sm:$0xff] %v2770_v61  ;;  %v1608_v5 = vsel %vm4100_vm1, 1.0, %v3923_v13  ;;  %v1607_v51 = vsel %vm4101_vm12, 1.0, %v3923_v13  ;;  %v1609_v60 = vsel %vm4102_vm9, 1.0, %v3923_v13  ;;  %vm4103_vm1 = vcmp.eq.s32.totalorder %v2430_v25, %v2365_v7  ;;  %2060 = vmatprep.subr.msk.bf16.mxu0 %vm2764_vm14, %v3911_v18 }
  0x49   :  { %4099 = vst [vmem:[#allocation37_spill] sm:$0xff] %v2776_v42  ;;  %v1610_v2 = vsel %vm4103_vm1, 1.0, %v3923_v13  ;;  %vm4104_vm12 = vcmp.eq.s32.totalorder %v2442_v27, %v2365_v7  ;;  %vm4105_vm9 = vcmp.eq.s32.totalorder %v2445_v28, %v2365_v7  ;;  %vm2817_vm1 = vmpackc.low %vm113_vm13, %vm111_vm3  ;;  %v4106_v25 = vmov 0 }
  0x4a   :  { %v1612_v23 = vsel %vm4104_vm12, 1.0, %v3923_v13  ;;  %v1614_v3 = vsel %vm4105_vm9, 1.0, %v3923_v13  ;;  %v4107_v25 = vsel %vm2817_vm1, 4294967295, %v4106_v25  ;;  %vm3907_vm12 = vcmp.eq.s32.totalorder %v2448_v29, %v2365_v7  ;;  %1870 = vmatpush1.bf16.msk.msra.mxu1 %vm2817_vm1, %v3911_v18 }
  0x4b   :  { %4108 = vst [vmem:[#allocation38_spill] sm:$0xff] %v4107_v25  ;;  %v1611_v27 = vsel %vm111_vm3, 1.0, %v3923_v13  ;;  %vm3906_vm9 = vcmp.eq.s32.totalorder %v2463_v32, %v2365_v7  ;;  %vm115_vm7 = vcmp.eq.s32.totalorder %v2448_v29, %v2363_v6  ;;  %vm3908_vm14 = vcmp.eq.s32.totalorder %v2463_v32, %v2363_v6  ;;  %2062 = vmatpush1.bf16.msk.msra.mxu0 %vm2817_vm1, %v3911_v18 }
  0x4c   :  { %v2830_v22 = vsub.f32 %v1608_v5, %v1608_v5  ;;  %v2832_v58 = vsub.f32 %v1607_v51, %v1607_v51  ;;  %v2834_v10 = vsub.f32 %v1609_v60, %v1609_v60  ;;  %v1613_v4 = vsel %vm113_vm13, 1.0, %v3923_v13  ;;  %vm2846_vm3 = vmpackc.low %vm3906_vm9, %vm3907_vm12 }
  0x4d   :  { %v4112_v34 = vsel %vm2846_vm3, 4294967295, %v4111_v34  ;;  %v2851_v51 = vsub.f32 %v1610_v2, %v1610_v2  ;;  %v2853_v60 = vsub.f32 %v1612_v23, %v1612_v23  ;;  %vm3916_vm13 = vcmp.eq.s32.totalorder %v2480_v36, %v2365_v7  ;;  %1872 = vmatprep.subr.msk.bf16.mxu1 %vm2846_vm3, %v3911_v18  ;;  %2064 = vmatprep.subr.msk.bf16.mxu0 %vm2846_vm3, %v3911_v18  ;;  %vm2880_vm9 = vmpackc.low %vm3908_vm14, %vm115_vm7 }
  0x4e   :  { %4109 = vst [vmem:[#allocation39_spill] sm:$0xff] %v2832_v58  ;;  %4110 = vst [vmem:[#allocation40_spill] sm:$0xff] %v2834_v10  ;;  %v2864_v31 = vsub.f32 %v1614_v3, %v1614_v3  ;;  %v2866_v5 = vsub.f32 %v1611_v27, %v1611_v27  ;;  %v4115_v2 = vmov 0  ;;  %vm3914_vm12 = vcmp.eq.s32.totalorder %v2489_v37, %v2365_v7 }
  0x4f   :  { %4113 = vst [vmem:[#allocation41_spill] sm:$0xff] %v4112_v34  ;;  %v4116_v2 = vsel %vm2880_vm9, 4294967295, %v4115_v2  ;;  %v2886_v3 = vsub.f32 %v1613_v4, %v1613_v4  ;;  %v1615_v23 = vsel %vm115_vm7, 1.0, %v3923_v13  ;;  %vm2898_vm14 = vmpackc.low %vm3914_vm12, %vm3916_vm13  ;;  %v4119_v27 = vmov 0 }
  0x50   :  { %4114 = vst [vmem:[#allocation42_spill] sm:$0xff] %v2866_v5  ;;  %4117 = vst [vmem:[#allocation43_spill] sm:$0xff] %v4116_v2  ;;  %v4120_v27 = vsel %vm2898_vm14, 4294967295, %v4119_v27  ;;  %vm119_vm3 = vcmp.eq.s32.totalorder %v2480_v36, %v2363_v6  ;;  %vm4122_vm7 = vcmp.eq.s32.totalorder %v2448_v29, %v2365_v7  ;;  %v2913_v34 = vadd.s32 184, %v2358_v1 }
  0x51   :  { %4118 = vst [vmem:[#allocation44_spill] sm:$0xff] %v2886_v3  ;;  %4121 = vst [vmem:[#allocation45_spill] sm:$0xff] %v4120_v27  ;;  %v1616_v18 = vsel %vm4122_vm7, 1.0, %v3923_v13  ;;  %vm4123_vm12 = vcmp.eq.s32.totalorder %v2463_v32, %v2365_v7  ;;  %vm4124_vm13 = vcmp.eq.s32.totalorder %v2463_v32, %v2363_v6  ;;  %v4125_v15 = vmov 1.0|1.0  }
  0x52   :  { %v1618_v25 = vsel %vm4123_vm12, 1.0, %v3923_v13  ;;  %v1617_v4 = vsel %vm4124_vm13, 1.0, %v3923_v13  ;;  %1874 = vmatpush1.bf16.msk.msra.mxu1 %vm2880_vm9, %v4125_v15  ;;  %2066 = vmatpush1.bf16.msk.msra.mxu0 %vm2880_vm9, %v4125_v15  ;;  %v2934_v28 = vsub.f32 %v1615_v23, %v1615_v23  ;;  %v1619_v32 = vsel %vm119_vm3, 1.0, %v3923_v13 }
  0x53   :  { %1876 = vmatprep.subr.msk.bf16.mxu1 %vm2898_vm14, %v4125_v15  ;;  %2068 = vmatprep.subr.msk.bf16.mxu0 %vm2898_vm14, %v4125_v15  ;;  %vm4127_vm12 = vcmp.eq.s32.totalorder %v2489_v37, %v2363_v6  ;;  %v4129_v23 = vmov 0  ;;  %vm4132_vm7 = vcmp.eq.s32.totalorder %v2480_v36, %v2365_v7  ;;  %vm4134_vm14 = vcmp.eq.s32.totalorder %v2495_v39, %v2365_v7 }
  0x54   :  { %4126 = vst [vmem:[#allocation46_spill] sm:$0xff] %v2934_v28  ;;  %v1621_v29 = vsel %vm4127_vm12, 1.0, %v3923_v13  ;;  %vm4128_vm13 = vmmov %vm4127_vm12  ;;  %v1620_v2 = vsel %vm4132_vm7, 1.0, %v3923_v13  ;;  %vm4133_vm12 = vcmp.eq.s32.totalorder %v2492_v38, %v2365_v7  ;;  %v4135_v21 = vmov 0 }
  0x55   :  { %vm2956_vm1 = vmpackc.low %vm4128_vm13, %vm119_vm3  ;;  %vm123_vm3 = vcmp.eq.s32.totalorder %v2492_v38, %v2363_v6  ;;  %vm125_vm13 = vcmp.eq.s32.totalorder %v2495_v39, %v2363_v6  ;;  %v2979_v27 = vsub.f32 %v1616_v18, %v1616_v18  ;;  %v2981_v36 = vsub.f32 %v1618_v25, %v1618_v25 }
  0x56   :  { %v4130_v23 = vsel %vm2956_vm1, 4294967295, %v4129_v23  ;;  %vm2971_vm9 = vmpackc.low %vm4134_vm14, %vm4133_vm12  ;;  %v2983_v13 = vsub.f32 %v1617_v4, %v1617_v4  ;;  %v4139_v45 = vmov 0.0   ;;  %vm4140_vm14 = vcmp.eq.s32.totalorder %v2489_v37, %v2365_v7  ;;  %1878 = vmatpush1.bf16.msk.msra.mxu1 %vm2956_vm1, %v4125_v15  ;;  %2070 = vmatpush1.bf16.msk.msra.mxu0 %vm2956_vm1, %v4125_v15 }
  0x57   :  { %4131 = vst [vmem:[#allocation47_spill] sm:$0xff] %v4130_v23  ;;  %v4136_v21 = vsel %vm2971_vm9, 4294967295, %v4135_v21  ;;  %v1622_v16 = vsel %vm4140_vm14, 1.0, %v4139_v45  ;;  %v2994_v9 = vsub.f32 %v1619_v32, %v1619_v32  ;;  %v2996_v18 = vsub.f32 %v1621_v29, %v1621_v29  ;;  %1880 = vmatprep.subr.msk.bf16.mxu1 %vm2971_vm9, %v4125_v15  ;;  %2072 = vmatprep.subr.msk.bf16.mxu0 %vm2971_vm9, %v4125_v15 }
  0x58   :  { %4137 = vst [vmem:[#allocation48_spill] sm:$0xff] %v4136_v21  ;;  %4138 = vst [vmem:[#allocation49_spill] sm:$0xff] %v2983_v13  ;;  %vm3936_vm12 = vcmp.eq.s32.totalorder %v2569_v53, %v2365_v7  ;;  %v3004_v4 = vsub.f32 %v1620_v2, %v1620_v2  ;;  %vm4143_vm14 = vcmp.eq.s32.totalorder %v2492_v38, %v2365_v7  ;;  %v4145_v2 = vmov 0 }
  0x59   :  { %4141 = vst [vmem:[#allocation50_spill] sm:$0xff] %v2994_v9  ;;  %4142 = vst [vmem:[#allocation51_spill] sm:$0xff] %v2996_v18  ;;  %v1624_v37 = vsel %vm4143_vm14, 1.0, %v4139_v45  ;;  %vm4144_vm7 = vcmp.eq.s32.totalorder %v2495_v39, %v2365_v7  ;;  %v1623_v32 = vsel %vm123_vm3, 1.0, %v4139_v45  ;;  %v1625_v25 = vsel %vm125_vm13, 1.0, %v4139_v45 }
  0x5a   :  { %v1626_v29 = vsel %vm4144_vm7, 1.0, %v4139_v45  ;;  %vm3026_vm14 = vmpackc.low %vm125_vm13, %vm123_vm3  ;;  %vm4148_vm7 = vcmp.eq.s32.totalorder %v2498_v40, %v2365_v7  ;;  %v4149_v21 = vmov 0  ;;  %vm127_vm1 = vcmp.eq.s32.totalorder %v2498_v40, %v2363_v6 }
  0x5b   :  { %v4146_v2 = vsel %vm3026_vm14, 4294967295, %v4145_v2  ;;  %vm3044_vm9 = vmpackc.low %vm3936_vm12, %vm4148_vm7  ;;  %vm129_vm3 = vcmp.eq.s32.totalorder %v2569_v53, %v2363_v6  ;;  %v3053_v39 = vsub.f32 %v1622_v16, %v1622_v16  ;;  %vm132_vm13 = vcmp.eq.s32.totalorder %v2594_v57, %v2365_v7  ;;  %1882 = vmatpush1.bf16.msk.msra.mxu1 %vm3026_vm14, %v4125_v15  ;;  %2074 = vmatpush1.bf16.msk.msra.mxu0 %vm3026_vm14, %v4125_v15 }
  0x5c   :  { %4147 = vst [vmem:[#allocation52_spill] sm:$0xff] %v4146_v2  ;;  %v4150_v21 = vsel %vm3044_vm9, 4294967295, %v4149_v21  ;;  %vm134_vm0 = vcmp.eq.s32.totalorder %v2913_v34, %v2365_v7  ;;  %v3061_v56 = vsub.f32 %v1624_v37, %v1624_v37  ;;  %v3063_v52 = vsub.f32 %v1626_v29, %v1626_v29  ;;  %1884 = vmatprep.subr.msk.bf16.mxu1 %vm3044_vm9, %v4125_v15 }
  0x5d   :  { %4151 = vst [vmem:[#allocation53_spill] sm:$0xff] %v4150_v21  ;;  %v3071_v16 = vsub.f32 %v1623_v32, %v1623_v32  ;;  %v3073_v38 = vsub.f32 %v1625_v25, %v1625_v25  ;;  %v1628_v37 = vsel %vm4148_vm7, 1.0, %v4139_v45  ;;  %2076 = vmatprep.subr.msk.bf16.mxu0 %vm3044_vm9, %v4125_v15  ;;  %v1627_v29 = vsel %vm127_vm1, 1.0, %v4139_v45  ;;  %vm3095_vm7 = vmpackc.low %vm129_vm3, %vm127_vm1 }
  0x5e   :  { %4152 = vst [vmem:[#allocation54_spill] sm:$0xff] %v3061_v56  ;;  %4153 = vst [vmem:[#allocation55_spill] sm:$0xff] %v3063_v52  ;;  %v4156_v25 = vmov 0  ;;  %v1629_v32 = vsel %vm129_vm3, 1.0, %v4139_v45  ;;  %v4159_v40 = vmov 0  ;;  %vm131_vm1 = vcmp.eq.s32.totalorder %v2594_v57, %v2363_v6 }
  0x5f   :  { %4154 = vst [vmem:[#allocation56_spill] sm:$0xff] %v3071_v16  ;;  %4155 = vst [vmem:[#allocation57_spill] sm:$0xff] %v3073_v38  ;;  %v4157_v25 = vsel %vm3095_vm7, 4294967295, %v4156_v25  ;;  %vm133_vm9 = vcmp.eq.s32.totalorder %v2913_v34, %v2363_v6  ;;  %v71_v0 = vadd.s32 192, %v2358_v1  ;;  %vm4162_vm3 = vcmp.eq.s32.totalorder %v2569_v53, %v2365_v7  ;;  %1886 = vmatpush1.bf16.msk.msra.mxu1 %vm3095_vm7, %v4125_v15 }
  0x60   :  { %4158 = vst [vmem:[#allocation58_spill] sm:$0xff] %v4157_v25  ;;  %vm3109_vm12 = vmpackc.low %vm134_vm0, %vm132_vm13  ;;  %v1630_v23 = vsel %vm4162_vm3, 1.0, %v4139_v45  ;;  %v1631_v21 = vsel %vm131_vm1, 1.0, %v4139_v45  ;;  %v72_v2 = vadd.s32 200, %v2358_v1  ;;  %v73_v47 = vadd.s32 208, %v2358_v1  ;;  %2078 = vmatpush1.bf16.msk.msra.mxu0 %vm3095_vm7, %v4125_v15 }
  0x61   :  { %v4160_v40 = vsel %vm3109_vm12, 4294967295, %v4159_v40  ;;  %v3128_v35 = vsub.f32 %v1628_v37, %v1628_v37  ;;  %v3133_v26 = vsub.f32 %v1627_v29, %v1627_v29  ;;  %vm3953_vm3 = vcmp.eq.s32.totalorder %v71_v0, %v2365_v7  ;;  %1888 = vmatprep.subr.msk.bf16.mxu1 %vm3109_vm12, %v4125_v15  ;;  %2080 = vmatprep.subr.msk.bf16.mxu0 %vm3109_vm12, %v4125_v15 }
  0x62   :  { %4161 = vst [vmem:[#allocation59_spill] sm:$0xff] %v4160_v40  ;;  %v74_v53 = vadd.s32 216, %v2358_v1  ;;  %v3140_v19 = vsub.f32 %v1629_v32, %v1629_v32  ;;  %v1632_v37 = vsel %vm132_vm13, 1.0, %v4139_v45  ;;  %v1634_v29 = vsel %vm134_vm0, 1.0, %v4139_v45  ;;  %vm3162_vm13 = vmpackc.low %vm133_vm9, %vm131_vm1 }
  0x63   :  { %4163 = vst [vmem:[#allocation60_spill] sm:$0xff] %v3128_v35  ;;  %4164 = vst [vmem:[#allocation61_spill] sm:$0xff] %v3133_v26  ;;  %v4166_v32 = vmov 0  ;;  %vm3952_vm0 = vcmp.eq.s32.totalorder %v72_v2, %v2365_v7  ;;  %v1633_v25 = vsel %vm133_vm9, 1.0, %v4139_v45  ;;  %v3171_v12 = vsub.f32 %v1631_v21, %v1631_v21  ;;  %1890 = vmatpush1.bf16.msk.msra.mxu1 %vm3162_vm13, %v4125_v15 }
  0x64   :  { %4165 = vst [vmem:[#allocation62_spill] sm:$0xff] %v3140_v19  ;;  %v4167_v32 = vsel %vm3162_vm13, 4294967295, %v4166_v32  ;;  %vm3177_vm12 = vmpackc.low %vm3952_vm0, %vm3953_vm3  ;;  %v4170_v57 = vmov 0  ;;  %vm135_vm1 = vcmp.eq.s32.totalorder %v71_v0, %v2363_v6  ;;  %vm137_vm7 = vcmp.eq.s32.totalorder %v72_v2, %v2363_v6  ;;  %2082 = vmatpush1.bf16.msk.msra.mxu0 %vm3162_vm13, %v4125_v15 }
  0x65   :  { %4168 = vst [vmem:[#allocation63_spill] sm:$0xff] %v4167_v32  ;;  %4169 = vst [vmem:[#allocation64_spill] sm:$0xff] %v3171_v12  ;;  %v4171_v57 = vsel %vm3177_vm12, 4294967295, %v4170_v57  ;;  %vm140_vm9 = vcmp.eq.s32.totalorder %v73_v47, %v2365_v7  ;;  %v3187_v34 = vadd.s32 224, %v2358_v1  ;;  %v3189_v21 = vsub.f32 %v1630_v23, %v1630_v23  ;;  %1892 = vmatprep.subr.msk.bf16.mxu1 %vm3177_vm12, %v4125_v15 }
  0x66   :  { %4172 = vst [vmem:[#allocation65_spill] sm:$0xff] %v4171_v57  ;;  %v3192_v56 = vsub.f32 %v1632_v37, %v1632_v37  ;;  %vm142_vm0 = vcmp.eq.s32.totalorder %v74_v53, %v2365_v7  ;;  %v3202_v40 = vsub.f32 %v1634_v29, %v1634_v29  ;;  %v3204_v23 = vsub.f32 %v1633_v25, %v1633_v25  ;;  %vm3219_vm3 = vmpackc.low %vm137_vm7, %vm135_vm1 }
  0x67   :  { %4173 = vst [vmem:[#allocation66_spill] sm:$0xff] %v3189_v21  ;;  %2084 = vmatprep.subr.msk.bf16.mxu0 %vm3177_vm12, %v4125_v15  ;;  %v1635_v37 = vsel %vm135_vm1, 1.0, %v4139_v45  ;;  %v4177_v29 = vmov 0  ;;  %v1637_v35 = vsel %vm137_vm7, 1.0, %v4139_v45  ;;  %vm3231_vm12 = vmpackc.low %vm142_vm0, %vm140_vm9  ;;  %v4180_v52 = vmov 0  ;;  %1894 = vmatpush1.bf16.msk.msra.mxu1 %vm3219_vm3, %v4125_v15 }
  0x68   :  { %4174 = vst [vmem:[#allocation67_spill] sm:$0xff] %v3192_v56  ;;  %4175 = vst [vmem:[#allocation68_spill] sm:$0xff] %v3202_v40  ;;  %v4178_v29 = vsel %vm3219_vm3, 4294967295, %v4177_v29  ;;  %v4181_v52 = vsel %vm3231_vm12, 4294967295, %v4180_v52  ;;  %vm139_vm13 = vcmp.eq.s32.totalorder %v73_v47, %v2363_v6  ;;  %vm141_vm1 = vcmp.eq.s32.totalorder %v74_v53, %v2363_v6  ;;  %2086 = vmatpush1.bf16.msk.msra.mxu0 %vm3219_vm3, %v4125_v15 }
  0x69   :  { %4176 = vst [vmem:[#allocation69_spill] sm:$0xff] %v3204_v23  ;;  %4179 = vst [vmem:[#allocation70_spill] sm:$0xff] %v4178_v29  ;;  %vm4183_vm14 = vcmp.eq.s32.totalorder %v71_v0, %v2365_v7  ;;  %v1639_v57 = vsel %vm139_vm13, 1.0, %v4139_v45  ;;  %v76_v32 = vadd.s32 232, %v2358_v1  ;;  %v3249_v12 = vsub.f32 %v1635_v37, %v1635_v37  ;;  %1896 = vmatprep.subr.msk.bf16.mxu1 %vm3231_vm12, %v4125_v15 }
  0x6a   :  { %4182 = vst [vmem:[#allocation71_spill] sm:$0xff] %v4181_v52  ;;  %v1636_v25 = vsel %vm4183_vm14, 1.0, %v4139_v45  ;;  %v1641_v0 = vsel %vm141_vm1, 1.0, %v4139_v45  ;;  %v3258_v40 = vadd.s32 240, %v2358_v1  ;;  %v3261_v19 = vadd.s32 248, %v2358_v1  ;;  %2088 = vmatprep.subr.msk.bf16.mxu0 %vm3231_vm12, %v4125_v15  ;;  %vm3281_vm7 = vmpackc.low %vm141_vm1, %vm139_vm13 }
  0x6b   :  { %4184 = vst [vmem:[#allocation72_spill] sm:$0xff] %v3249_v12  ;;  %vm4185_vm14 = vcmp.eq.s32.totalorder %v72_v2, %v2365_v7  ;;  %v3266_v37 = vsub.f32 %v1637_v35, %v1637_v35  ;;  %v1640_v29 = vsel %vm140_vm9, 1.0, %v4139_v45  ;;  %v4187_v1 = vmov 0  ;;  %1898 = vmatpush1.bf16.msk.msra.mxu1 %vm3281_vm7, %v4125_v15 }
  0x6c   :  { %v1638_v26 = vsel %vm4185_vm14, 1.0, %v4139_v45  ;;  %v4188_v1 = vsel %vm3281_vm7, 4294967295, %v4187_v1  ;;  %vm146_vm14 = vcmp.eq.s32.totalorder %v76_v32, %v2365_v7  ;;  %v1642_v35 = vsel %vm142_vm0, 1.0, %v4139_v45  ;;  %2090 = vmatpush1.bf16.msk.msra.mxu0 %vm3281_vm7, %v4125_v15 }
  0x6d   :  { %4186 = vst [vmem:[#allocation73_spill] sm:$0xff] %v3266_v37  ;;  %4189 = vst [vmem:[#allocation74_spill] sm:$0xff] %v4188_v1  ;;  %v3289_v2 = vsub.f32 %v1639_v57, %v1639_v57  ;;  %vm4191_vm9 = vcmp.eq.s32.totalorder %v3187_v34, %v2365_v7  ;;  %v4192_v47 = vmov 0  ;;  %vm143_vm13 = vcmp.eq.s32.totalorder %v3187_v34, %v2363_v6  ;;  %v282_v57 = vld [vmem:[#allocation5 + $0x8] sm:$0xff] }
  0x6e   :  { %vm3296_vm12 = vmpackc.low %vm146_vm14, %vm4191_vm9  ;;  %vm3976_vm1 = vcmp.eq.s32.totalorder %v76_v32, %v2363_v6  ;;  %v3304_v53 = vsub.f32 %v1641_v0, %v1641_v0  ;;  %vm148_vm0 = vcmp.eq.s32.totalorder %v3258_v40, %v2365_v7  ;;  %vm3986_vm3 = vcmp.eq.s32.totalorder %v3261_v19, %v2365_v7 }
  0x6f   :  { %4190 = vst [vmem:[#allocation75_spill] sm:$0xff] %v3289_v2  ;;  %v4193_v47 = vsel %vm3296_vm12, 4294967295, %v4192_v47  ;;  %v3310_v56 = vsub.f32 %v1636_v25, %v1636_v25  ;;  %v3312_v21 = vsub.f32 %v1638_v26, %v1638_v26  ;;  %v1644_v0 = vsel %vm4191_vm9, 1.0, %v4139_v45  ;;  %1900 = vmatprep.subr.msk.bf16.mxu1 %vm3296_vm12, %v4125_v15  ;;  %2092 = vmatprep.subr.msk.bf16.mxu0 %vm3296_vm12, %v4125_v15  ;;  %vm3344_vm9 = vmpackc.low %vm3976_vm1, %vm143_vm13 }
  0x70   :  { %4194 = vst [vmem:[#allocation76_spill] sm:$0xff] %v4193_v47  ;;  %4195 = vst [vmem:[#allocation77_spill] sm:$0xff] %v3304_v53  ;;  %v3326_v52 = vsub.f32 %v1640_v29, %v1640_v29  ;;  %v3328_v26 = vsub.f32 %v1642_v35, %v1642_v35  ;;  %v1646_v38 = vsel %vm146_vm14, 1.0, %v4139_v45  ;;  %v4200_v29 = vmov 0  ;;  %v281_v35 = vld [vmem:[#allocation5] sm:$0xff]  ;;  %1902 = vmatpush1.bf16.msk.msra.mxu1 %vm3344_vm9, %v4125_v15  ;;  %2094 = vmatpush1.bf16.msk.msra.mxu0 %vm3344_vm9, %v4125_v15 }
  0x71   :  { %4196 = vst [vmem:[#allocation78_spill] sm:$0xff] %v3310_v56  ;;  %4197 = vst [vmem:[#allocation79_spill] sm:$0xff] %v3312_v21  ;;  %v4201_v29 = vsel %vm3344_vm9, 4294967295, %v4200_v29  ;;  %v4203_v47 = vmov 0  ;;  %vm147_vm12 = vcmp.eq.s32.totalorder %v3258_v40, %v2363_v6  ;;  %vm149_vm1 = vcmp.eq.s32.totalorder %v3261_v19, %v2363_v6 }
  0x72   :  { %4198 = vst [vmem:[#allocation80_spill] sm:$0xff] %v3326_v52  ;;  %4199 = vst [vmem:[#allocation81_spill] sm:$0xff] %v3328_v26  ;;  %v3363_v1 = vand.u32 4294901760, %v282_v57  ;;  %v3366_v2 = vsub.f32 %v1644_v0, %v1644_v0  ;;  %v430_v37 = vand.u32 4294901760, %v2500_v41  ;;  %v442_v12 = vand.u32 4294901760, %v2509_v43 }
  0x73   :  { %4202 = vst [vmem:[#allocation82_spill] sm:$0xff] %v4201_v29  ;;  %vm3355_vm14 = vmpackc.low %vm3986_vm3, %vm148_vm0  ;;  %v3370_v26 = vsub.f32 %v1646_v38, %v1646_v38  ;;  %v3376_v52 = vsel %vm143_vm13, 1.0, %v4139_v45  ;;  %v3387_v25 = vand.u32 4294901760, %v281_v35  ;;  %vm4211_vm3 = vcmp.eq.s32.totalorder %v76_v32, %v2363_v6 }
  0x74   :  { %v4204_v47 = vsel %vm3355_vm14, 4294967295, %v4203_v47  ;;  %4206 = vst [vmem:[#allocation84_spill] sm:$0xff] %v3363_v1  ;;  %4207 = vst [vmem:[#allocation85_spill] sm:$0xff] %v3366_v2  ;;  %v3385_v0 = vsub.f32 %v282_v57, %v3363_v1  ;;  %v3392_v38 = vsel %vm4211_vm3, 1.0, %v4139_v45  ;;  %1904 = vmatprep.subr.msk.bf16.mxu1 %vm3355_vm14, %v4125_v15  ;;  %2096 = vmatprep.subr.msk.bf16.mxu0 %vm3355_vm14, %v4125_v15  ;;  %v4212_v34 = vmov 0 }
  0x75   :  { %4205 = vst [vmem:[#allocation83_spill] sm:$0xff] %v4204_v47  ;;  %4208 = vst [vmem:[#allocation86_spill] sm:$0xff] %v3370_v26  ;;  %v431_v32 = vsub.f32 %v2500_v41, %v430_v37  ;;  %v443_v57 = vsub.f32 %v2509_v43, %v442_v12  ;;  %v4215_v29 = vand.u32 4294901760, %v2408_v20  ;;  %v4216_v26 = vand.u32 4294901760, %v2422_v24 }
  0x76   :  { %4209 = vst [vmem:[#allocation87_spill] sm:$0xff] %v3385_v0  ;;  %4210 = vst [vmem:[#allocation88_spill] sm:$0xff] %v3387_v25  ;;  %v413_v53 = vand.u32 4294901760, %v3385_v0  ;;  %v2099_v2 = vpack.c.bf16 %v442_v12, %v430_v37  ;;  %v3418_v21 = vsub.f32 %v281_v35, %v3387_v25  ;;  %v454_v23 = vand.u32 4294901760, %v2550_v50 }
  0x77   :  { %vm3406_vm13 = vmpackc.low %vm149_vm1, %vm147_vm12  ;;  %v2101_v47 = vpack.c.bf16 %v4216_v26, %v4215_v29  ;;  %v432_v6 = vand.u32 4294901760, %v431_v32  ;;  %v444_v56 = vand.u32 4294901760, %v443_v57  ;;  %v466_v16 = vand.u32 4294901760, %v2571_v54 }
  0x78   :  { %v4213_v34 = vsel %vm3406_vm13, 4294967295, %v4212_v34  ;;  %4217 = vst [vmem:[#allocation90_spill] sm:$0xff] %v3418_v21  ;;  %v4218_v41 = vand.u32 4294901760, %v2573_v55  ;;  %1906 = vmatpush1.bf16.msk.msra.mxu1 %vm3406_vm13, %v4125_v15  ;;  %2098 = vmatpush1.bf16.msk.msra.mxu0 %vm3406_vm13, %v4125_v15  ;;  %v414_v12 = vsub.f32 %v3385_v0, %v413_v53  ;;  %v419_v37 = vand.u32 4294901760, %v3418_v21 }
  0x79   :  { %4214 = vst [vmem:[#allocation89_spill] sm:$0xff] %v4213_v34  ;;  %v455_v26 = vsub.f32 %v2550_v50, %v454_v23  ;;  %v4219_v29 = vand.u32 4294901760, %v2597_v59  ;;  %v1907_v32 = vpack.c.bf16 %v444_v56, %v432_v6  ;;  %1155 = vmatprep.mubr.f32.mxu0 %v413_v53  ;;  %2100 = vmatprep.subr.bf16.mxu0 %v2099_v2  ;;  %v4220_v15 = vand.u32 4294901760, %v2514_v44 }
  0x7a   :  { %v461_v43 = vsub.f32 %v2573_v55, %v4218_v41  ;;  %v467_v41 = vsub.f32 %v2571_v54, %v466_v16  ;;  %v2103_v57 = vpack.c.bf16 %v466_v16, %v454_v23  ;;  %v415_v24 = vand.u32 4294901760, %v414_v12 }
  0x7b   :  { %v473_v35 = vsub.f32 %v2597_v59, %v4219_v29  ;;  %v420_v34 = vsub.f32 %v3418_v21, %v419_v37  ;;  %v456_v20 = vand.u32 4294901760, %v455_v26  ;;  %1908 = vmatprep.subr.bf16.mxu1 %v1907_v32  ;;  %v4221_v50 = vand.u32 4294901760, %v2535_v48  ;;  %1159 = vmatmul.mubr.f32.vlgmr.msra.gmra.mrb[0].mxu0 %v419_v37 }
  0x7c   :  { %v462_v25 = vand.u32 4294901760, %v461_v43  ;;  %v468_v29 = vand.u32 4294901760, %v467_v41  ;;  %v478_v6 = vand.u32 4294901760, %v2612_v62  ;;  %v490_v56 = vand.u32 4294901760, %v2690_v33  ;;  %416 = vmatprep.mubr.f32.mxu1 %v415_v24  ;;  %2102 = vmatpush1.bf16.msra.mxu0 %v2101_v47 }
  0x7d   :  { %v474_v0 = vand.u32 4294901760, %v473_v35  ;;  %v1909_v18 = vpack.c.bf16 %v4221_v50, %v4220_v15  ;;  %v421_v16 = vand.u32 4294901760, %v420_v34  ;;  %v4222_v43 = vand.u32 4294901760, %v2573_v55  ;;  %2104 = vmatprep.subr.bf16.mxu0 %v2103_v57  ;;  %1422 = vmatprep.mubr.f32.mxu0 %v3363_v1  ;;  %v4279_v55 = vld [vmem:[#allocation80_spill] sm:$0xff] }
  0x7e   :  { %v4223_v23 = vand.u32 4294901760, %v2597_v59  ;;  %v4224_v53 = vand.u32 4294901760, %v2635_v8  ;;  %v4225_v48 = vand.u32 4294901760, %v2656_v11  ;;  %v1911_v15 = vpack.c.bf16 %v468_v29, %v456_v20 }
  0x7f   :  { %v479_v12 = vsub.f32 %v2612_v62, %v478_v6  ;;  %v491_v24 = vsub.f32 %v2690_v33, %v490_v56  ;;  %v2107_v47 = vpack.c.bf16 %v490_v56, %v478_v6  ;;  %422 = vmatmul.mubr.f32.vlgmr.msra.gmra.mrb[0].mxu1 %v421_v16  ;;  %v1913_v34 = vpack.c.bf16 %v474_v0, %v462_v25 }
  0x80   :  { %v2105_v2 = vpack.c.bf16 %v4223_v23, %v4222_v43  ;;  %v485_v44 = vsub.f32 %v2635_v8, %v4224_v53  ;;  %v497_v50 = vsub.f32 %v2656_v11, %v4225_v48  ;;  %v502_v35 = vand.u32 4294901760, %v2711_v49  ;;  %1910 = vmatpush1.bf16.msra.mxu1 %v1909_v18  ;;  %813 = vmatprep.mubr.f32.mxu1 %v3363_v1 }
  0x81   :  { %v480_v32 = vand.u32 4294901760, %v479_v12  ;;  %v492_v41 = vand.u32 4294901760, %v491_v24  ;;  %v514_v43 = vand.u32 4294901760, %v2727_v63  ;;  %v4226_v20 = vand.u32 4294901760, %v2682_v17  ;;  %1912 = vmatprep.subr.bf16.mxu1 %v1911_v15 }
  0x82   :  { %v486_v37 = vand.u32 4294901760, %v485_v44  ;;  %v498_v26 = vand.u32 4294901760, %v497_v50  ;;  %2106 = vmatpush1.bf16.msra.mxu0 %v2105_v2  ;;  %v4227_v25 = vmov %v4224_v53  ;;  %v4228_v0 = vmov %v4225_v48 }
  0x83   :  { %v509_v57 = vsub.f32 %v2682_v17, %v4226_v20  ;;  %v2109_v29 = vpack.c.bf16 %v4228_v0, %v4227_v25  ;;  %v503_v6 = vsub.f32 %v2711_v49, %v502_v35  ;;  %v4229_v18 = vand.u32 4294901760, %v2684_v30  ;;  %2108 = vmatprep.subr.bf16.mxu0 %v2107_v47 }
  0x84   :  { %v526_v16 = vand.u32 4294901760, %v2756_v14  ;;  %v1915_v23 = vpack.c.bf16 %v492_v41, %v480_v32  ;;  %v1917_v53 = vpack.c.bf16 %v498_v26, %v486_v37  ;;  %v515_v44 = vsub.f32 %v2727_v63, %v514_v43  ;;  %1914 = vmatpush1.bf16.msra.mxu1 %v1913_v34 }
  0x85   :  { %v521_v56 = vsub.f32 %v2684_v30, %v4229_v18  ;;  %v2111_v48 = vpack.c.bf16 %v514_v43, %v502_v35  ;;  %v504_v2 = vand.u32 4294901760, %v503_v6  ;;  %v510_v50 = vand.u32 4294901760, %v509_v57 }
  0x86   :  { %v527_v12 = vsub.f32 %v2756_v14, %v526_v16  ;;  %v516_v24 = vand.u32 4294901760, %v515_v44  ;;  %v538_v20 = vand.u32 4294901760, %v2768_v46  ;;  %v4230_v25 = vand.u32 4294901760, %v2770_v61  ;;  %1916 = vmatprep.subr.bf16.mxu1 %v1915_v23  ;;  %2110 = vmatpush1.bf16.msra.mxu0 %v2109_v29 }
  0x87   :  { %v522_v15 = vand.u32 4294901760, %v521_v56  ;;  %v4231_v32 = vand.u32 4294901760, %v2776_v42  ;;  %v3484_v37 = vsub.f32 %v3376_v52, %v3376_v52  ;;  %v4232_v26 = vand.u32 4294901760, %v2682_v17  ;;  %2112 = vmatprep.subr.bf16.mxu0 %v2111_v48  ;;  %v4285_v17 = vld [vmem:[#allocation73_spill] sm:$0xff] }
  0x88   :  { %v533_v0 = vsub.f32 %v2770_v61, %v4230_v25  ;;  %v4233_v34 = vmov %v4229_v18  ;;  %v528_v41 = vand.u32 4294901760, %v527_v12  ;;  %v550_v43 = vand.u32 4294901760, %v2830_v22  ;;  %1918 = vmatpush1.bf16.msra.mxu1 %v1917_v53 }
  0x89   :  { %v545_v47 = vsub.f32 %v2776_v42, %v4231_v32  ;;  %v2113_v35 = vpack.c.bf16 %v4233_v34, %v4232_v26  ;;  %v1919_v57 = vpack.c.bf16 %v516_v24, %v504_v2  ;;  %v539_v6 = vsub.f32 %v2768_v46, %v538_v20 }
  0x8a   :  { %v2115_v18 = vpack.c.bf16 %v538_v20, %v526_v16  ;;  %v534_v56 = vand.u32 4294901760, %v533_v0  ;;  %v551_v52 = vsub.f32 %v2830_v22, %v550_v43  ;;  %v562_v23 = vand.u32 4294901760, %v2851_v51 }
  0x8b   :  { %v546_v44 = vand.u32 4294901760, %v545_v47  ;;  %v4234_v29 = vand.u32 4294901760, %v2832_v58  ;;  %v1921_v32 = vpack.c.bf16 %v522_v15, %v510_v50  ;;  %v540_v12 = vand.u32 4294901760, %v539_v6  ;;  %1920 = vmatprep.subr.bf16.mxu1 %v1919_v57  ;;  %2114 = vmatpush1.bf16.msra.mxu0 %v2113_v35 }
  0x8c   :  { %v4235_v26 = vand.u32 4294901760, %v2834_v10  ;;  %v574_v2 = vand.u32 4294901760, %v2853_v60  ;;  %v3503_v16 = vsub.f32 %v3392_v38, %v3392_v38  ;;  %v4236_v24 = vand.u32 4294901760, %v2770_v61  ;;  %2116 = vmatprep.subr.bf16.mxu0 %v2115_v18 }
  0x8d   :  { %v557_v25 = vsub.f32 %v2832_v58, %v4234_v29  ;;  %v4237_v20 = vand.u32 4294901760, %v2776_v42  ;;  %v552_v53 = vand.u32 4294901760, %v551_v52  ;;  %v563_v50 = vsub.f32 %v2851_v51, %v562_v23  ;;  %1922 = vmatpush1.bf16.msra.mxu1 %v1921_v32 }
  0x8e   :  { %v569_v48 = vsub.f32 %v2834_v10, %v4235_v26  ;;  %v1648_v15 = vsel %vm148_vm0, 1.0, %v4139_v45  ;;  %v1923_v47 = vpack.c.bf16 %v540_v12, %v528_v41  ;;  %v2119_v34 = vpack.c.bf16 %v562_v23, %v550_v43 }
  0x8f   :  { %v2117_v0 = vpack.c.bf16 %v4237_v20, %v4236_v24  ;;  %v575_v38 = vsub.f32 %v2853_v60, %v574_v2  ;;  %v1925_v57 = vpack.c.bf16 %v546_v44, %v534_v56  ;;  %v564_v35 = vand.u32 4294901760, %v563_v50 }
  0x90   :  { %v558_v6 = vand.u32 4294901760, %v557_v25  ;;  %v586_v29 = vand.u32 4294901760, %v2864_v31  ;;  %v570_v26 = vand.u32 4294901760, %v569_v48  ;;  %v4238_v52 = vand.u32 4294901760, %v2866_v5  ;;  %1924 = vmatprep.subr.bf16.mxu1 %v1923_v47 }
  0x91   :  { %v4239_v20 = vand.u32 4294901760, %v2886_v3  ;;  %v598_v41 = vand.u32 4294901760, %v2979_v27  ;;  %2118 = vmatpush1.bf16.msra.mxu0 %v2117_v0  ;;  %v1927_v43 = vpack.c.bf16 %v564_v35, %v552_v53  ;;  %v4240_v18 = vand.u32 4294901760, %v2832_v58  ;;  %1926 = vmatpush1.bf16.msra.mxu1 %v1925_v57 }
  0x92   :  { %v581_v24 = vsub.f32 %v2866_v5, %v4238_v52  ;;  %v4241_v56 = vand.u32 4294901760, %v2834_v10  ;;  %v576_v23 = vand.u32 4294901760, %v575_v38  ;;  %v587_v25 = vsub.f32 %v2864_v31, %v586_v29  ;;  %2120 = vmatprep.subr.bf16.mxu0 %v2119_v34 }
  0x93   :  { %v593_v21 = vsub.f32 %v2886_v3, %v4239_v20  ;;  %v2123_v32 = vpack.c.bf16 %v586_v29, %v574_v2  ;;  %v599_v12 = vsub.f32 %v2979_v27, %v598_v41  ;;  %v610_v48 = vand.u32 4294901760, %v2981_v36  ;;  %1928 = vmatprep.subr.bf16.mxu1 %v1927_v43  ;;  %v4248_v43 = vld [vmem:[#allocation51_spill] sm:$0xff] }
  0x94   :  { %v2121_v44 = vpack.c.bf16 %v4241_v56, %v4240_v18  ;;  %v4242_v50 = vand.u32 4294901760, %v2934_v28  ;;  %vm4243_vm3 = vcmp.eq.s32.totalorder %v3261_v19, %v2365_v7  ;;  %v588_v53 = vand.u32 4294901760, %v587_v25 }
  0x95   :  { %v1650_v0 = vsel %vm4243_vm3, 1.0, %v4139_v45  ;;  %v4244_v38 = vand.u32 4294901760, %v2983_v13  ;;  %v622_v2 = vand.u32 4294901760, %v3004_v4  ;;  %v1929_v34 = vpack.c.bf16 %v570_v26, %v558_v6 }
  0x96   :  { %v605_v47 = vsub.f32 %v2934_v28, %v4242_v50  ;;  %v582_v29 = vand.u32 4294901760, %v581_v24  ;;  %v594_v52 = vand.u32 4294901760, %v593_v21  ;;  %v611_v20 = vsub.f32 %v2981_v36, %v610_v48  ;;  %2122 = vmatpush1.bf16.msra.mxu0 %v2121_v44 }
  0x97   :  { %v617_v35 = vsub.f32 %v2983_v13, %v4244_v38  ;;  %v1931_v18 = vpack.c.bf16 %v588_v53, %v576_v23  ;;  %v4245_v56 = vand.u32 4294901760, %v2866_v5  ;;  %v4246_v7 = vand.u32 4294901760, %v2886_v3  ;;  %2124 = vmatprep.subr.bf16.mxu0 %v2123_v32  ;;  %v4250_v53 = vld [vmem:[#allocation54_spill] sm:$0xff]  ;;  %1930 = vmatpush1.bf16.msra.mxu1 %v1929_v34 }
  0x98   :  { %v600_v50 = vand.u32 4294901760, %v599_v12  ;;  %v623_v10 = vsub.f32 %v3004_v4, %v622_v2  ;;  %v612_v38 = vand.u32 4294901760, %v611_v20  ;;  %v2127_v58 = vpack.c.bf16 %v610_v48, %v598_v41 }
  0x99   :  { %v2125_v25 = vpack.c.bf16 %v4246_v7, %v4245_v56  ;;  %v606_v57 = vand.u32 4294901760, %v605_v47  ;;  %v634_v6 = vand.u32 4294901760, %v3053_v39  ;;  %v618_v21 = vand.u32 4294901760, %v617_v35  ;;  %1932 = vmatprep.subr.bf16.mxu1 %v1931_v18 }
  0x9a   :  { %v4247_v26 = vand.u32 4294901760, %v2994_v9  ;;  %v4249_v44 = vand.u32 4294901760, %v4248_v43  ;;  %v646_v56 = vand.u32 4294901760, %v4250_v53  ;;  %v1933_v32 = vpack.c.bf16 %v594_v52, %v582_v29  ;;  %v4254_v52 = vld [vmem:[#allocation60_spill] sm:$0xff] }
  0x9b   :  { %v4251_v41 = vand.u32 4294901760, %v2934_v28  ;;  %v4252_v48 = vand.u32 4294901760, %v2983_v13  ;;  %v635_v35 = vsub.f32 %v3053_v39, %v634_v6  ;;  %2126 = vmatpush1.bf16.msra.mxu0 %v2125_v25  ;;  %v1935_v20 = vpack.c.bf16 %v612_v38, %v600_v50  ;;  %v4257_v38 = vld [vmem:[#allocation56_spill] sm:$0xff] }
  0x9c   :  { %v629_v24 = vsub.f32 %v2994_v9, %v4247_v26  ;;  %v641_v23 = vsub.f32 %v4248_v43, %v4249_v44  ;;  %v624_v7 = vand.u32 4294901760, %v623_v10  ;;  %v647_v26 = vsub.f32 %v4250_v53, %v646_v56  ;;  %v4253_v44 = vld [vmem:[#allocation55_spill] sm:$0xff]  ;;  %2128 = vmatprep.subr.bf16.mxu0 %v2127_v58  ;;  %1934 = vmatpush1.bf16.msra.mxu1 %v1933_v32 }
  0x9d   :  { %v2129_v47 = vpack.c.bf16 %v4252_v48, %v4251_v41  ;;  %v658_v3 = vand.u32 4294901760, %v4253_v44  ;;  %v3563_v5 = vsub.f32 %v1648_v15, %v1648_v15  ;;  %v636_v34 = vand.u32 4294901760, %v635_v35  ;;  %v4259_v35 = vld [vmem:[#allocation57_spill] sm:$0xff]  ;;  %1936 = vmatprep.subr.bf16.mxu1 %v1935_v20 }
  0x9e   :  { %v2131_v29 = vpack.c.bf16 %v634_v6, %v622_v2  ;;  %v670_v12 = vand.u32 4294901760, %v4254_v52  ;;  %v1937_v28 = vpack.c.bf16 %v618_v21, %v606_v57  ;;  %v630_v13 = vand.u32 4294901760, %v629_v24  ;;  %v4265_v20 = vld [vmem:[#allocation61_spill] sm:$0xff] }
  0x9f   :  { %v642_v41 = vand.u32 4294901760, %v641_v23  ;;  %v659_v48 = vsub.f32 %v4253_v44, %v658_v3  ;;  %v4255_v18 = vand.u32 4294901760, %v2994_v9  ;;  %v4256_v10 = vand.u32 4294901760, %v4248_v43  ;;  %2130 = vmatpush1.bf16.msra.mxu0 %v2129_v47  ;;  %v4261_v23 = vld [vmem:[#allocation66_spill] sm:$0xff]  ;;  %v4264_v43 = vld [vmem:[#allocation67_spill] sm:$0xff] }
  0xa0   :  { %v648_v50 = vand.u32 4294901760, %v647_v26  ;;  %v4258_v15 = vand.u32 4294901760, %v4257_v38  ;;  %v4260_v2 = vand.u32 4294901760, %v4259_v35  ;;  %v1939_v57 = vpack.c.bf16 %v636_v34, %v624_v7  ;;  %2132 = vmatprep.subr.bf16.mxu0 %v2131_v29  ;;  %1938 = vmatpush1.bf16.msra.mxu1 %v1937_v28 }
  0xa1   :  { %v2133_v25 = vpack.c.bf16 %v4256_v10, %v4255_v18  ;;  %v660_v21 = vand.u32 4294901760, %v659_v48  ;;  %v671_v24 = vsub.f32 %v4254_v52, %v670_v12  ;;  %v682_v32 = vand.u32 4294901760, %v4261_v23  ;;  %v4267_v48 = vld [vmem:[#allocation62_spill] sm:$0xff] }
  0xa2   :  { %v653_v58 = vsub.f32 %v4257_v38, %v4258_v15  ;;  %v665_v6 = vsub.f32 %v4259_v35, %v4260_v2  ;;  %v3579_v9 = vsub.f32 %v1650_v0, %v1650_v0  ;;  %v2135_v26 = vpack.c.bf16 %v658_v3, %v646_v56  ;;  %v4269_v35 = vld [vmem:[#allocation68_spill] sm:$0xff]  ;;  %1940 = vmatprep.subr.bf16.mxu1 %v1939_v57  ;;  %v4270_v38 = vld [vmem:[#allocation78_spill] sm:$0xff] }
  0xa3   :  { %v4262_v18 = vmov %v4258_v15  ;;  %v4263_v10 = vmov %v4260_v2  ;;  %v694_v42 = vand.u32 4294901760, %v4264_v43  ;;  %v1941_v2 = vpack.c.bf16 %v642_v41, %v630_v13  ;;  %2134 = vmatpush1.bf16.msra.mxu0 %v2133_v25  ;;  %v4272_v57 = vld [vmem:[#allocation64_spill] sm:$0xff] }
  0xa4   :  { %v2137_v15 = vpack.c.bf16 %v4263_v10, %v4262_v18  ;;  %v683_v47 = vsub.f32 %v4261_v23, %v682_v32  ;;  %v4266_v7 = vand.u32 4294901760, %v4265_v20  ;;  %v4268_v61 = vand.u32 4294901760, %v4267_v48  ;;  %2136 = vmatprep.subr.bf16.mxu0 %v2135_v26 }
  0xa5   :  { %v654_v3 = vand.u32 4294901760, %v653_v58  ;;  %v666_v56 = vand.u32 4294901760, %v665_v6  ;;  %v695_v29 = vsub.f32 %v4264_v43, %v694_v42  ;;  %v706_v18 = vand.u32 4294901760, %v4269_v35  ;;  %1942 = vmatpush1.bf16.msra.mxu1 %v1941_v2 }
  0xa6   :  { %v677_v34 = vsub.f32 %v4265_v20, %v4266_v7  ;;  %v689_v0 = vsub.f32 %v4267_v48, %v4268_v61  ;;  %v1943_v13 = vpack.c.bf16 %v660_v21, %v648_v50  ;;  %v672_v41 = vand.u32 4294901760, %v671_v24  ;;  %v4274_v21 = vld [vmem:[#allocation69_spill] sm:$0xff] }
  0xa7   :  { %v684_v10 = vand.u32 4294901760, %v683_v47  ;;  %v718_v30 = vand.u32 4294901760, %v4270_v38  ;;  %v1647_v61 = vsel %vm147_vm12, 1.0, %v4139_v45  ;;  %v2139_v28 = vpack.c.bf16 %v682_v32, %v670_v12  ;;  %v4278_v32 = vld [vmem:[#allocation79_spill] sm:$0xff]  ;;  %2138 = vmatpush1.bf16.msra.mxu0 %v2137_v15 }
  0xa8   :  { %v707_v58 = vsub.f32 %v4269_v35, %v706_v18  ;;  %v678_v6 = vand.u32 4294901760, %v677_v34  ;;  %v690_v11 = vand.u32 4294901760, %v689_v0  ;;  %v4273_v25 = vand.u32 4294901760, %v4272_v57  ;;  %1944 = vmatprep.subr.bf16.mxu1 %v1943_v13 }
  0xa9   :  { %v4275_v24 = vand.u32 4294901760, %v4274_v21  ;;  %v1945_v7 = vpack.c.bf16 %v666_v56, %v654_v3  ;;  %v4276_v8 = vand.u32 4294901760, %v4265_v20  ;;  %v4277_v40 = vand.u32 4294901760, %v4267_v48  ;;  %2140 = vmatprep.subr.bf16.mxu0 %v2139_v28  ;;  %v4287_v28 = vld [vmem:[#allocation85_spill] sm:$0xff] }
  0xaa   :  { %v701_v50 = vsub.f32 %v4272_v57, %v4273_v25  ;;  %v696_v12 = vand.u32 4294901760, %v695_v29  ;;  %v730_v59 = vand.u32 4294901760, %v4278_v32  ;;  %v1947_v34 = vpack.c.bf16 %v684_v10, %v672_v41 }
  0xab   :  { %v713_v47 = vsub.f32 %v4274_v21, %v4275_v24  ;;  %v2141_v26 = vpack.c.bf16 %v4277_v40, %v4276_v8  ;;  %v708_v0 = vand.u32 4294901760, %v707_v58  ;;  %v719_v25 = vsub.f32 %v4270_v38, %v718_v30  ;;  %v4282_v58 = vld [vmem:[#allocation81_spill] sm:$0xff]  ;;  %1946 = vmatpush1.bf16.msra.mxu1 %v1945_v7  ;;  %v4283_v40 = vld [vmem:[#allocation72_spill] sm:$0xff] }
  0xac   :  { %v742_v1 = vand.u32 4294901760, %v4279_v55  ;;  %v1649_v2 = vsel %vm149_vm1, 1.0, %v4139_v45  ;;  %v2143_v3 = vpack.c.bf16 %v706_v18, %v694_v42  ;;  %v4280_v8 = vand.u32 4294901760, %v4272_v57  ;;  %1948 = vmatprep.subr.bf16.mxu1 %v1947_v34 }
  0xad   :  { %v4281_v56 = vmov %v4275_v24  ;;  %v731_v15 = vsub.f32 %v4278_v32, %v730_v59  ;;  %v1949_v13 = vpack.c.bf16 %v690_v11, %v678_v6  ;;  %v702_v41 = vand.u32 4294901760, %v701_v50  ;;  %2142 = vmatpush1.bf16.msra.mxu0 %v2141_v26 }
  0xae   :  { %v2145_v29 = vpack.c.bf16 %v4281_v56, %v4280_v8  ;;  %v714_v10 = vand.u32 4294901760, %v713_v47  ;;  %v754_v24 = vand.u32 4294901760, %v4282_v58  ;;  %v4284_v48 = vand.u32 4294901760, %v4283_v40  ;;  %2144 = vmatprep.subr.bf16.mxu0 %v2143_v3 }
  0xaf   :  { %v4286_v45 = vand.u32 4294901760, %v4285_v17  ;;  %v743_v18 = vsub.f32 %v4279_v55, %v742_v1  ;;  %v766_v8 = vand.u32 4294901760, %v4287_v28  ;;  %v1951_v11 = vpack.c.bf16 %v708_v0, %v696_v12  ;;  %1950 = vmatpush1.bf16.msra.mxu1 %v1949_v13 }
  0xb0   :  { %v725_v19 = vsub.f32 %v4283_v40, %v4284_v48  ;;  %v720_v6 = vand.u32 4294901760, %v719_v25  ;;  %v732_v50 = vand.u32 4294901760, %v731_v15  ;;  %v755_v47 = vsub.f32 %v4282_v58, %v754_v24  ;;  %v4288_v48 = vld [vmem:[#allocation75_spill] sm:$0xff] }
  0xb1   :  { %v737_v42 = vsub.f32 %v4285_v17, %v4286_v45  ;;  %v3634_v7 = vsub.f32 %v1647_v61, %v1647_v61  ;;  %v2147_v56 = vpack.c.bf16 %v730_v59, %v718_v30  ;;  %v4289_v21 = vand.u32 4294901760, %v4288_v48  ;;  %v4290_v45 = vld [vmem:[#allocation77_spill] sm:$0xff]  ;;  %v4294_v61 = vld [vmem:[#allocation86_spill] sm:$0xff]  ;;  %1952 = vmatprep.subr.bf16.mxu1 %v1951_v11  ;;  %2146 = vmatpush1.bf16.msra.mxu0 %v2145_v29 }
  0xb2   :  { %v4291_v20 = vand.u32 4294901760, %v4290_v45  ;;  %v3642_v32 = vsub.f32 %v1649_v2, %v1649_v2  ;;  %v1953_v26 = vpack.c.bf16 %v714_v10, %v702_v41  ;;  %v4292_v12 = vand.u32 4294901760, %v4283_v40  ;;  %v4297_v11 = vld [vmem:[#allocation18_spill] sm:$0xff] }
  0xb3   :  { %v749_v57 = vsub.f32 %v4288_v48, %v4289_v21  ;;  %v4293_v34 = vand.u32 4294901760, %v4285_v17  ;;  %v778_v25 = vand.u32 4294901760, %v4294_v61  ;;  %v726_v59 = vand.u32 4294901760, %v725_v19  ;;  %2148 = vmatprep.subr.bf16.mxu0 %v2147_v56 }
  0xb4   :  { %v761_v55 = vsub.f32 %v4290_v45, %v4291_v20  ;;  %v738_v30 = vand.u32 4294901760, %v737_v42  ;;  %v744_v3 = vand.u32 4294901760, %v743_v18  ;;  %v767_v21 = vsub.f32 %v4287_v28, %v766_v8  ;;  %1954 = vmatpush1.bf16.msra.mxu1 %v1953_v26  ;;  %v4301_v28 = vld [vmem:[#allocation21_spill] sm:$0xff] }
  0xb5   :  { %v2149_v0 = vpack.c.bf16 %v4293_v34, %v4292_v12  ;;  %v1955_v15 = vpack.c.bf16 %v732_v50, %v720_v6  ;;  %v756_v20 = vand.u32 4294901760, %v755_v47  ;;  %v779_v2 = vsub.f32 %v4294_v61, %v778_v25  ;;  %v4298_v6 = vld [vmem:[#allocation19_spill] sm:$0xff] }
  0xb6   :  { %v790_v41 = vand.u32 4294901760, %v3563_v5  ;;  %v2151_v10 = vpack.c.bf16 %v754_v24, %v742_v1  ;;  %v750_v17 = vand.u32 4294901760, %v749_v57  ;;  %v762_v12 = vand.u32 4294901760, %v761_v55 }
  0xb7   :  { %v802_v34 = vand.u32 4294901760, %v3579_v9  ;;  %v796_v13 = vand.u32 4294901760, %v3634_v7  ;;  %v4295_v19 = vand.u32 4294901760, %v3484_v37  ;;  %v4296_v29 = vand.u32 4294901760, %v3503_v16  ;;  %1956 = vmatprep.subr.bf16.mxu1 %v1955_v15  ;;  %2150 = vmatpush1.bf16.msra.mxu0 %v2149_v0 }
  0xb8   :  { %v1971_v50 = vpack.c.bf16 %v4298_v6, %v4297_v11  ;;  %v808_v47 = vand.u32 4294901760, %v3642_v32  ;;  %v1957_v1 = vpack.c.bf16 %v738_v30, %v726_v59  ;;  %v4299_v55 = vand.u32 4294901760, %v4288_v48  ;;  %2152 = vmatprep.subr.bf16.mxu0 %v2151_v10 }
  0xb9   :  { %v773_v42 = vsub.f32 %v3484_v37, %v4295_v19  ;;  %v785_v18 = vsub.f32 %v3503_v16, %v4296_v29  ;;  %v4300_v57 = vand.u32 4294901760, %v4290_v45  ;;  %v768_v56 = vand.u32 4294901760, %v767_v21 }
  0xba   :  { %v1959_v19 = vpack.c.bf16 %v756_v20, %v744_v3  ;;  %v780_v40 = vand.u32 4294901760, %v779_v2  ;;  %v791_v61 = vsub.f32 %v3563_v5, %v790_v41  ;;  %v803_v29 = vsub.f32 %v3579_v9, %v802_v34  ;;  %1958 = vmatpush1.bf16.msra.mxu1 %v1957_v1  ;;  %v4305_v1 = vld [vmem:[#allocation80_spill] sm:$0xff] }
  0xbb   :  { %v2153_v24 = vpack.c.bf16 %v4300_v57, %v4299_v55  ;;  %v1961_v11 = vpack.c.bf16 %v762_v12, %v750_v17  ;;  %v2155_v6 = vpack.c.bf16 %v778_v25, %v766_v8  ;;  %v1975_v26 = vpack.c.bf16 %v2571_v54, %v4301_v28  ;;  %v4307_v57 = vld [vmem:[#allocation86_spill] sm:$0xff] }
  0xbc   :  { %v1979_v59 = vpack.c.bf16 %v2690_v33, %v2612_v62  ;;  %v774_v30 = vand.u32 4294901760, %v773_v42  ;;  %v786_v55 = vand.u32 4294901760, %v785_v18  ;;  %v4302_v21 = vand.u32 4294901760, %v3484_v37  ;;  %1960 = vmatprep.subr.bf16.mxu1 %v1959_v19 }
  0xbd   :  { %v4303_v0 = vand.u32 4294901760, %v3503_v16  ;;  %v1983_v15 = vpack.c.bf16 %v2727_v63, %v2711_v49  ;;  %v797_v17 = vsub.f32 %v3634_v7, %v796_v13  ;;  %v809_v8 = vsub.f32 %v3642_v32, %v808_v47  ;;  %2154 = vmatpush1.bf16.msra.mxu0 %v2153_v24 }
  0xbe   :  { %v1987_v54 = vpack.c.bf16 %v2768_v46, %v2756_v14  ;;  %v1991_v62 = vpack.c.bf16 %v2851_v51, %v2830_v22  ;;  %v1963_v33 = vpack.c.bf16 %v780_v40, %v768_v56  ;;  %v792_v28 = vand.u32 4294901760, %v791_v61  ;;  %2156 = vmatprep.subr.bf16.mxu0 %v2155_v6  ;;  %1962 = vmatpush1.bf16.msra.mxu1 %v1961_v11  ;;  %v4326_v6 = vld [vmem:[#allocation32_spill] sm:$0xff]  ;;  %v4346_v22 = vld [vmem:[#allocation41_spill] sm:$0xff]  ;;  %v4348_v51 = vld [vmem:[#allocation46_spill] sm:$0xff] }
  0xbf   :  { %v2157_v3 = vpack.c.bf16 %v4303_v0, %v4302_v21  ;;  %v804_v25 = vand.u32 4294901760, %v803_v29  ;;  %v1995_v20 = vpack.c.bf16 %v2864_v31, %v2853_v60  ;;  %v2159_v49 = vpack.c.bf16 %v802_v34, %v790_v41  ;;  %v4304_v34 = vld [vmem:[#allocation79_spill] sm:$0xff]  ;;  %v4312_v0 = vld [vmem:[#allocation88_spill] sm:$0xff]  ;;  %v4352_v31 = vld [vmem:[#allocation45_spill] sm:$0xff] }
  0xc0   :  { %v1999_v63 = vpack.c.bf16 %v2981_v36, %v2979_v27  ;;  %v2003_v2 = vpack.c.bf16 %v3053_v39, %v3004_v4  ;;  %v1965_v46 = vpack.c.bf16 %v786_v55, %v774_v30  ;;  %v2161_v14 = vpack.c.bf16 %v808_v47, %v796_v13  ;;  %1964 = vmatprep.subr.bf16.mxu1 %v1963_v33  ;;  %v4306_v47 = vld [vmem:[#allocation85_spill] sm:$0xff]  ;;  %v4310_v30 = vld [vmem:[#allocation14_spill] sm:$0xff]  ;;  %v4311_v55 = vld [vmem:[#allocation15_spill] sm:$0xff] }
  0xc1   :  { %v2007_v10 = vpack.c.bf16 %v4253_v44, %v4250_v53  ;;  %v2011_v40 = vpack.c.bf16 %v4261_v23, %v4254_v52  ;;  %v798_v61 = vand.u32 4294901760, %v797_v17  ;;  %v810_v12 = vand.u32 4294901760, %v809_v8  ;;  %2158 = vmatpush1.bf16.msra.mxu0 %v2157_v3  ;;  %v4315_v8 = vld [vmem:[#allocation84_spill] sm:$0xff]  ;;  %v4316_v33 = vld [vmem:[#allocation23_spill] sm:$0xff]  ;;  %v4331_v3 = vld [vmem:[#allocation37_spill] sm:$0xff] }
  0xc2   :  { %v2015_v41 = vpack.c.bf16 %v4269_v35, %v4264_v43  ;;  %v2019_v42 = vpack.c.bf16 %v4304_v34, %v4270_v38  ;;  %v1967_v18 = vpack.c.bf16 %v804_v25, %v792_v28  ;;  %v2023_v13 = vpack.c.bf16 %v4282_v58, %v4305_v1  ;;  %2160 = vmatprep.subr.bf16.mxu0 %v2159_v49  ;;  %v4317_v28 = vld [vmem:[#allocation25_spill] sm:$0xff]  ;;  %v4318_v49 = vld [vmem:[#allocation87_spill] sm:$0xff]  ;;  %v4354_v60 = vld [vmem:[#allocation50_spill] sm:$0xff] }
  0xc3   :  { %v2027_v24 = vpack.c.bf16 %v4307_v57, %v4306_v47  ;;  %v2031_v56 = vpack.c.bf16 %v3579_v9, %v3563_v5  ;;  %v2033_v19 = vpack.c.bf16 %v3642_v32, %v3634_v7  ;;  %1966 = vmatpush1.bf16.msra.mxu1 %v1965_v46  ;;  %v1969_v29 = vpack.c.bf16 %v810_v12, %v798_v61  ;;  %v4322_v61 = vld [vmem:[#allocation29_spill] sm:$0xff]  ;;  %v4343_v46 = vld [vmem:[#allocation44_spill] sm:$0xff]  ;;  %v4370_v53 = vld [vmem:[#allocation59_spill] sm:$0xff] }
  0xc4   :  { %1968 = vmatprep.subr.bf16.mxu1 %v1967_v18  ;;  %v4308_v11 = vmov 1.0|1.0   ;;  %v1973_v21 = vpack.c.bf16 %v4311_v55, %v4310_v30  ;;  %v1977_v25 = vpack.c.bf16 %v4317_v28, %v4316_v33  ;;  %v4334_v33 = vld [vmem:[#allocation33_spill] sm:$0xff]  ;;  %v4337_v28 = vld [vmem:[#allocation40_spill] sm:$0xff]  ;;  %v4350_v18 = vld [vmem:[#allocation43_spill] sm:$0xff]  ;;  %vm4353_vm12 = vnez %v4352_v31 }
  0xc5   :  { %2162 = vmatpush1.bf16.msra.mxu0 %v2161_v14  ;;  %v4321_v14 = vld [vmem:[#allocation27_spill] sm:$0xff]  ;;  %v4358_v27 = vld [vmem:[#allocation48_spill] sm:$0xff]  ;;  %v4364_v4 = vld [vmem:[#allocation53_spill] sm:$0xff]  ;;  %v2025_v35 = vpack.c.bf16 %v4290_v45, %v4288_v48  ;;  %v2029_v34 = vpack.c.bf16 %v3503_v16, %v3484_v37 }
  0xc6   :  { %2164 = vmatprep.subr.msk.bf16.mxu0 %vm2386_vm4, %v4308_v11  ;;  %v1981_v12 = vpack.c.bf16 %v4322_v61, %v4321_v14  ;;  %v4344_v61 = vld [vmem:[#allocation38_spill] sm:$0xff]  ;;  %vm4359_vm0 = vnez %v4358_v27  ;;  %v4360_v36 = vld [vmem:[#allocation56_spill] sm:$0xff]  ;;  %v4366_v39 = vld [vmem:[#allocation61_spill] sm:$0xff] }
  0xc7   :  { %1970 = vmatpush1.bf16.msra.mxu1 %v1969_v29  ;;  %v4372_v44 = vld [vmem:[#allocation64_spill] sm:$0xff]  ;;  %v4376_v52 = vld [vmem:[#allocation65_spill] sm:$0xff]  ;;  %v4382_v43 = vld [vmem:[#allocation71_spill] sm:$0xff] }
  0xc8   :  { %1424 = vmatmul.mubr.f32.vlgmr.msra.gmra.mrb[0].mxu0 %v4312_v0  ;;  %1972 = vmatprep.subr.bf16.mxu1 %v1971_v50  ;;  %v4342_v50 = vld [vmem:[#allocation42_spill] sm:$0xff]  ;;  %v4378_v23 = vld [vmem:[#allocation72_spill] sm:$0xff] }
  0xc9   :  { %2166 = vmatpush1.bf16.msk.msra.mxu0 %vm2404_vm5, %v4308_v11  ;;  %1559 = vmatprep.mubr.f32.mxu0 %v4315_v8  ;;  %v4332_v8 = vld [vmem:[#allocation30_spill] sm:$0xff]  ;;  %v1997_v14 = vpack.c.bf16 %v4343_v46, %v4342_v50  ;;  %v4385_v38 = vld [vmem:[#allocation76_spill] sm:$0xff] }
  0xca   :  { %2168 = vmatprep.subr.msk.bf16.mxu0 %vm2436_vm8, %v4308_v11  ;;  %815 = vmatmul.mubr.f32.vlgmr.msra.gmra.mrb[0].mxu1 %v4312_v0  ;;  %vm4333_vm5 = vnez %v4332_v8  ;;  %vm4335_vm8 = vnez %v4334_v33  ;;  %v4380_v8 = vld [vmem:[#allocation70_spill] sm:$0xff] }
  0xcb   :  { %1974 = vmatpush1.bf16.msra.mxu1 %v1973_v21  ;;  %1015 = vmatprep.mubr.f32.mxu1 %v4318_v49  ;;  %v4328_v21 = vld [vmem:[#allocation28_spill] sm:$0xff]  ;;  %v4338_v49 = vld [vmem:[#allocation34_spill] sm:$0xff] }
  0xcc   :  { %1976 = vmatprep.subr.bf16.mxu1 %v1975_v26  ;;  %v4325_v26 = vld [vmem:[#allocation31_spill] sm:$0xff]  ;;  %vm4329_vm4 = vnez %v4328_v21  ;;  %v4368_v21 = vld [vmem:[#allocation58_spill] sm:$0xff] }
  0xcd   :  { %2170 = vmatpush1.bf16.msk.msra.mxu0 %vm2473_vm11, %v4308_v11  ;;  %v1985_v30 = vpack.c.bf16 %v4326_v6, %v4325_v26  ;;  %vm4339_vm11 = vnez %v4338_v49  ;;  %v4356_v26 = vld [vmem:[#allocation47_spill] sm:$0xff]  ;;  %v4390_v37 = vld [vmem:[#allocation90_spill] sm:$0xff] }
  0xce   :  { %2172 = vmatprep.subr.msk.bf16.mxu0 %vm2528_vm15, %v4308_v11  ;;  %vm4357_vm1 = vnez %v4356_v26 }
  0xcf   :  { %1978 = vmatpush1.bf16.msra.mxu1 %v1977_v25 }
  0xd0   :  { %1980 = vmatprep.subr.bf16.mxu1 %v1979_v59  ;;  %v4330_v59 = vld [vmem:[#allocation36_spill] sm:$0xff] }
  0xd1   :  { %2174 = vmatpush1.bf16.msk.msra.mxu0 %vm2562_vm2, %v4308_v11  ;;  %v1989_v17 = vpack.c.bf16 %v4331_v3, %v4330_v59  ;;  %vm4345_vm2 = vnez %v4344_v61  ;;  %v4374_v3 = vld [vmem:[#allocation63_spill] sm:$0xff] }
  0xd2   :  { %2176 = vmatprep.subr.msk.bf16.mxu0 %vm2587_vm6, %v4308_v11  ;;  %vm4347_vm6 = vnez %v4346_v22 }
  0xd3   :  { %1982 = vmatpush1.bf16.msra.mxu1 %v1981_v12 }
  0xd4   :  { %1984 = vmatprep.subr.bf16.mxu1 %v1983_v15  ;;  %v4336_v15 = vld [vmem:[#allocation39_spill] sm:$0xff] }
  0xd5   :  { %2178 = vmatpush1.bf16.msk.msra.mxu0 %vm2618_vm10, %v4308_v11  ;;  %v1993_v25 = vpack.c.bf16 %v4337_v28, %v4336_v15  ;;  %vm4351_vm10 = vnez %v4350_v18 }
  0xd6   :  { %2180 = vmatprep.subr.msk.bf16.mxu0 %vm4329_vm4, %v4308_v11  ;;  %vm4365_vm4 = vnez %v4364_v4 }
  0xd7   :  { %1986 = vmatpush1.bf16.msra.mxu1 %v1985_v30  ;;  %v4362_v30 = vld [vmem:[#allocation52_spill] sm:$0xff] }
  0xd8   :  { %1988 = vmatprep.subr.bf16.mxu1 %v1987_v54  ;;  %v4340_v54 = vld [vmem:[#allocation35_spill] sm:$0xff]  ;;  %vm4363_vm3 = vnez %v4362_v30 }
  0xd9   :  { %2182 = vmatpush1.bf16.msk.msra.mxu0 %vm4333_vm5, %v4308_v11  ;;  %vm4341_vm15 = vnez %v4340_v54  ;;  %vm4369_vm5 = vnez %v4368_v21 }
  0xda   :  { %2184 = vmatprep.subr.msk.bf16.mxu0 %vm4335_vm8, %v4308_v11  ;;  %vm4371_vm8 = vnez %v4370_v53 }
  0xdb   :  { %1990 = vmatpush1.bf16.msra.mxu1 %v1989_v17 }
  0xdc   :  { %1992 = vmatprep.subr.bf16.mxu1 %v1991_v62  ;;  %v4349_v62 = vld [vmem:[#allocation49_spill] sm:$0xff] }
  0xdd   :  { %2186 = vmatpush1.bf16.msk.msra.mxu0 %vm4339_vm11, %v4308_v11  ;;  %v2001_v12 = vpack.c.bf16 %v4349_v62, %v4348_v51  ;;  %vm4375_vm11 = vnez %v4374_v3 }
  0xde   :  { %2188 = vmatprep.subr.msk.bf16.mxu0 %vm4341_vm15, %v4308_v11  ;;  %vm4377_vm15 = vnez %v4376_v52 }
  0xdf   :  { %1994 = vmatpush1.bf16.msra.mxu1 %v1993_v25 }
  0xe0   :  { %1996 = vmatprep.subr.bf16.mxu1 %v1995_v20  ;;  %v4355_v20 = vld [vmem:[#allocation51_spill] sm:$0xff] }
  0xe1   :  { %2190 = vmatpush1.bf16.msk.msra.mxu0 %vm4345_vm2, %v4308_v11  ;;  %v2005_v29 = vpack.c.bf16 %v4355_v20, %v4354_v60  ;;  %vm4381_vm2 = vnez %v4380_v8 }
  0xe2   :  { %2192 = vmatprep.subr.msk.bf16.mxu0 %vm4347_vm6, %v4308_v11  ;;  %vm4383_vm6 = vnez %v4382_v43 }
  0xe3   :  { %1998 = vmatpush1.bf16.msra.mxu1 %v1997_v14 }
  0xe4   :  { %2000 = vmatprep.subr.bf16.mxu1 %v1999_v63  ;;  %v4361_v63 = vld [vmem:[#allocation57_spill] sm:$0xff] }
  0xe5   :  { %2194 = vmatpush1.bf16.msk.msra.mxu0 %vm4351_vm10, %v4308_v11  ;;  %v2009_v6 = vpack.c.bf16 %v4361_v63, %v4360_v36  ;;  %vm4386_vm10 = vnez %v4385_v38 }
  0xe6   :  { %2196 = vmatprep.subr.msk.bf16.mxu0 %vm4353_vm12, %v4308_v11 }
  0xe7   :  { %2002 = vmatpush1.bf16.msra.mxu1 %v2001_v12 }
  0xe8   :  { %2004 = vmatprep.subr.bf16.mxu1 %v2003_v2  ;;  %v4367_v2 = vld [vmem:[#allocation62_spill] sm:$0xff] }
  0xe9   :  { %2198 = vmatpush1.bf16.msk.msra.mxu0 %vm4357_vm1, %v4308_v11  ;;  %v2013_v55 = vpack.c.bf16 %v4367_v2, %v4366_v39 }
  0xea   :  { %2200 = vmatprep.subr.msk.bf16.mxu0 %vm4359_vm0, %v4308_v11 }
  0xeb   :  { %2006 = vmatpush1.bf16.msra.mxu1 %v2005_v29 }
  0xec   :  { %2008 = vmatprep.subr.bf16.mxu1 %v2007_v10  ;;  %v4373_v10 = vld [vmem:[#allocation69_spill] sm:$0xff] }
  0xed   :  { %2202 = vmatpush1.bf16.msk.msra.mxu0 %vm4363_vm3, %v4308_v11  ;;  %v2017_v59 = vpack.c.bf16 %v4373_v10, %v4372_v44 }
  0xee   :  { %2204 = vmatprep.subr.msk.bf16.mxu0 %vm4365_vm4, %v4308_v11 }
  0xef   :  { %2010 = vmatpush1.bf16.msra.mxu1 %v2009_v6 }
  0xf0   :  { %2012 = vmatprep.subr.bf16.mxu1 %v2011_v40  ;;  %v4379_v40 = vld [vmem:[#allocation73_spill] sm:$0xff] }
  0xf1   :  { %2206 = vmatpush1.bf16.msk.msra.mxu0 %vm4369_vm5, %v4308_v11  ;;  %v2021_v17 = vpack.c.bf16 %v4379_v40, %v4378_v23 }
  0xf2   :  { %2208 = vmatprep.subr.msk.bf16.mxu0 %vm4371_vm8, %v4308_v11 }
  0xf3   :  { %2014 = vmatpush1.bf16.msra.mxu1 %v2013_v55 }
  0xf4   :  { %2016 = vmatprep.subr.bf16.mxu1 %v2015_v41 }
  0xf5   :  { %2210 = vmatpush1.bf16.msk.msra.mxu0 %vm4375_vm11, %v4308_v11 }
  0xf6   :  { %2212 = vmatprep.subr.msk.bf16.mxu0 %vm4377_vm15, %v4308_v11 }
  0xf7   :  { %2018 = vmatpush1.bf16.msra.mxu1 %v2017_v59 }
  0xf8   :  { %2020 = vmatprep.subr.bf16.mxu1 %v2019_v42 }
  0xf9   :  { %2214 = vmatpush1.bf16.msk.msra.mxu0 %vm4381_vm2, %v4308_v11 }
  0xfa   :  { %2216 = vmatprep.subr.msk.bf16.mxu0 %vm4383_vm6, %v4308_v11 }
  0xfb   :  { %2022 = vmatpush1.bf16.msra.mxu1 %v2021_v17 }
  0xfc   :  { %2024 = vmatprep.subr.bf16.mxu1 %v2023_v13 }
  0xfd   :  { %2218 = vmatpush1.bf16.msk.msra.mxu0 %vm3281_vm7, %v4308_v11 }
  0xfe   :  { %2220 = vmatprep.subr.msk.bf16.mxu0 %vm4386_vm10, %v4308_v11 }
  0xff   :  { %2026 = vmatpush1.bf16.msra.mxu1 %v2025_v35 }
 0x100   :  { %2028 = vmatprep.subr.bf16.mxu1 %v2027_v24 }
 0x101   :  { %2222 = vmatpush1.bf16.msk.msra.mxu0 %vm3344_vm9, %v4308_v11 }
 0x102   :  { %2224 = vmatprep.subr.msk.bf16.mxu0 %vm3355_vm14, %v4308_v11 }
 0x103   :  { %2030 = vmatpush1.bf16.msra.mxu1 %v2029_v34 }
 0x104   :  { %2032 = vmatprep.subr.bf16.mxu1 %v2031_v56 }
 0x105   :  { %2226 = vmatpush1.bf16.msk.msra.mxu0 %vm3406_vm13, %v4308_v11 }
 0x107   :  { %2034 = vmatpush1.bf16.msra.mxu1 %v2033_v19 }
 0x108   :  { %1561 = vmatmul.mubr.f32.vlgmr.msra.gmra.mrb[0].mxu0 %v4312_v0 }
 0x10a   :  { %1018 = vmatmul.mubr.f32.vlgmr.msra.gmra.mrb[0].mxu1 %v4390_v37 }
 0x1db   :  { %v1562_v16 = vpop.f32.mrb[0].mxu0 }
 0x1dc   :  { %v1564_v42 = vpop.f32.mrb[1].mxu0 }
 0x1dd   :  { %v1019_v1 = vpop.f32.mrb[0].mxu1 }
 0x1de   :  { %v2227_v13 = vadd.f32 %v1562_v16, %v1019_v1  ;;  %v1021_v47 = vpop.f32.mrb[1].mxu1 }
 0x1df   :  { %v2228_v9 = vadd.f32 %v1564_v42, %v1021_v47 }
 0x1e0   :  { %1569 = vst [vmem:[#allocation7] sm:$0xff] %v2227_v13 }
 0x1e1   :  { %1570 = vst [vmem:[#allocation7 + $0x8] sm:$0xff] %v2228_v9 }
 0x1e2   :  { %2297 = shalt.err (!%p2294_p6)
}
 0x1e3   :  { %s2298_s8 = scalar_lea.hbm %s3889_s2, 256 }
 0x1e4   :  { %p2299_p7 = scmp.ne.s32.totalorder %s3889_s2, %s2298_s8  ;;  %p2302_p8 = scmp.lt.u32.totalorder %s2298_s8, %s3889_s2 }
 0x1e6   :  { %p2304_p9 = pnand %p2302_p8, %p2299_p7 }
 0x1e8   :  { %2307 = shalt.err (!%p2304_p9)
}
 0x1e9   :  { %1580 = dma.vmem_to_hbm [thread:$0]  %s1578_s4, 256, %s3889_s2, [#allocation4]  }
 0x1ea   :  { %2312 = dma.done.wait [#allocation4], 256  }
 0x1eb   :  { %2313 = vsyncadd [#allocation4], 4294967040 }
 0x1ec   :  { %1584 = vsyncpa [#allocation3], 1 }
 0x1ed   :  { %1585 = vsyncpa [#allocation6], 1 }
 0x1ee   :  { %1586 = vsyncpa [#allocation4], 1 }

</bundles_post_ra>
